<compile_context>
chip_gen: v7x
topology: tpu7x:2x2x1
jax: 0.10.0
libtpu: 0.0.40
codegen_flags: <defaults>
</compile_context>

<pallas_src>
import functools

import jax
import jax.numpy as jnp
from jax.experimental import pallas as pl
from jax.experimental.pallas import tpu as pltpu

_EPS = 1e-5


# ----------------------------------------------------------------------------
# Fused kernel: one grid step = one batch chunk, whole layer stack in VMEM.
# ----------------------------------------------------------------------------
def fused_duration_kernel(x_ref, gb_ref, w_ref, b_ref, lng_ref, lnb_ref,
                          wf_ref, bf_ref, o_ref, xpad_sc):
    """All ConvReLUNorm+CLN blocks plus the final 1x1 conv + ReLU.

    x_ref   : (bc, T, C)       input activations (compute dtype)
    gb_ref  : (L, bc*T, 2*C)   precomputed per-row CLN (gamma|beta) (f32)
    w_ref   : (L*K, C, C)      conv weights, tap-major per layer (compute dtype)
    b_ref   : (L, C)           conv biases (f32)
    lng_ref : (L, C)           LayerNorm gamma (f32)
    lnb_ref : (L, C)           LayerNorm beta (f32)
    wf_ref  : (1, C)           final 1x1 conv weight row (f32)
    bf_ref  : (1, 1)           final 1x1 conv bias (f32)
    o_ref   : (bc*T, 1)        output (f32)
    xpad_sc : (bc, T+K-1, C)   zero-haloed activation scratch (compute dtype)
    """
    LK, C, _ = w_ref.shape
    L = b_ref.shape[0]
    K = LK // L
    bc, T, _ = x_ref.shape
    M = bc * T
    pad = (K - 1) // 2
    inv_c = 1.0 / C

    # Zero ONLY the halo rows; interior rows are fully overwritten every layer.
    if pad > 0:
        xpad_sc[:, :pad, :] = jnp.zeros((bc, pad, C), xpad_sc.dtype)
        xpad_sc[:, pad + T:, :] = jnp.zeros((bc, pad, C), xpad_sc.dtype)

    h = x_ref[...].reshape(M, C)                   # batch folded into matmul M dim
    out_f32 = None
    for l in range(L):                             # static unroll over layers (L small)
        # --- Conv1d (same padding, stride 1): K shifted matmuls, no im2col slab ---
        xpad_sc[:, pad:pad + T, :] = h.reshape(bc, T, C)
        acc = b_ref[l:l + 1, :] + jnp.dot(
            xpad_sc[:, 0:T, :].reshape(M, C), w_ref[l * K + 0],
            preferred_element_type=jnp.float32)
        for k in range(1, K):                      # static unroll over taps
            acc = acc + jnp.dot(
                xpad_sc[:, k:k + T, :].reshape(M, C), w_ref[l * K + k],
                preferred_element_type=jnp.float32)

        # --- ReLU ---
        a = jnp.maximum(acc, 0.0)

        # --- LayerNorm over channels (affine), one-pass stats, clamped variance ---
        mu = jnp.sum(a, axis=-1, keepdims=True) * inv_c
        var = jnp.maximum(jnp.sum(a * a, axis=-1, keepdims=True) * inv_c - mu * mu, 0.0)
        a = (a - mu) * jax.lax.rsqrt(var + _EPS)
        a = a * lng_ref[l:l + 1, :] + lnb_ref[l:l + 1, :]
        # Dropout: identity at inference.

        # --- Conditional (style-adaptive) LayerNorm; gamma/beta precomputed per row ---
        mu2 = jnp.sum(a, axis=-1, keepdims=True) * inv_c
        var2 = jnp.maximum(jnp.sum(a * a, axis=-1, keepdims=True) * inv_c - mu2 * mu2, 0.0)
        an = (a - mu2) * jax.lax.rsqrt(var2 + _EPS)
        gamma = gb_ref[l, :, 0:C]                  # (M, C) f32
        beta = gb_ref[l, :, C:2 * C]
        out_f32 = (1.0 + gamma) * an + beta        # (M, C) f32

        h = out_f32.astype(xpad_sc.dtype)          # next layer's matmul operand

    # --- Final 1x1 Conv1d (C -> 1) + ReLU as a VPU lane reduction (no MXU) ---
    y = jnp.sum(out_f32 * wf_ref[...], axis=-1, keepdims=True) + bf_ref[...]   # (M, 1)
    # TODO(synk): lane-dense (B, T) output slab for the large-Ntext path; the masked
    #             lane-1 store is negligible at M = 32.
    o_ref[...] = jnp.maximum(y, 0.0).astype(o_ref.dtype)


# ----------------------------------------------------------------------------
# Wrapper
# ----------------------------------------------------------------------------
@functools.partial(jax.jit, static_argnames=("compute_dtype",))
def duration_predictor(phoneme_features, style_embedding, params,
                       compute_dtype=jnp.bfloat16):
    """phoneme_features: [B, C, Ntext] f32; style_embedding: [B, S, N] f32.
    Returns duration: [B, 1, Ntext] f32."""
    B, cin, T = phoneme_features.shape
    layers = params["layers"]
    L = len(layers)
    K, _, C = layers[0]["conv_w"].shape

    # Guards for unsupported configurations (would silently diverge otherwise).
    assert K % 2 == 1, "even conv_kernel_size unsupported (PyTorch pad=k//2 changes length)"
    assert cin == C, "fused kernel assumes uniform channel width across layers"
    for lyr in layers:
        assert lyr["conv_w"].shape == (K, C, C), "fused kernel assumes uniform channels"
    assert T % 16 == 0, "fused kernel assumes Ntext a multiple of 16 (sublane packing)"
    # TODO(synk): conv_stride > 1 not implemented (duration predictors use stride=1).

    x = jnp.transpose(phoneme_features, (0, 2, 1)).astype(compute_dtype)   # [B, T, C]
    s = jnp.mean(style_embedding, axis=2)                                  # [B, S]

    # Hoisted CLN projection: one (B,S) x (S, L*2C) matmul, expanded to per-row rows
    # so the kernel applies gamma/beta with plain elementwise ops (no in-kernel bcast).
    cw = jnp.concatenate([lyr["cln_w"] for lyr in layers], axis=1)         # (S, L*2C)
    cb = jnp.concatenate([lyr["cln_b"] for lyr in layers], axis=1)         # (1, L*2C)
    gb = jnp.dot(s, cw, precision=jax.lax.Precision.HIGHEST) + cb          # (B, L*2C)
    gb = jnp.transpose(gb.reshape(B, L, 2 * C), (1, 0, 2))                 # (L, B, 2C)
    gb_rows = jnp.repeat(gb, T, axis=1)                                    # (L, B*T, 2C)

    # Stacked per-layer parameters; conv weights tap-major (l*K + k -> (C, C)).
    Wc = jnp.stack([lyr["conv_w"] for lyr in layers])                      # (L, K, C, C)
    Wc = Wc.reshape(L * K, C, C).astype(compute_dtype)
    bconv = jnp.stack([lyr["conv_b"][0] for lyr in layers])                # (L, C)
    lg = jnp.stack([lyr["ln_g"][0] for lyr in layers])                     # (L, C)
    lb = jnp.stack([lyr["ln_b"][0] for lyr in layers])                     # (L, C)
    wf = params["final_w"].reshape(1, C)                                   # (1, C)
    bf = params["final_b"].reshape(1, 1)                                   # (1, 1)

    # Fold batch into the matmul M dimension. Grid over batch chunks only when a
    # single chunk would push M well past the MXU height (~512 rows); at B=2, T=16
    # this is a single grid step (M = 32) — no per-step overhead, one fat matmul.
    fitting = [d for d in range(1, B + 1) if B % d == 0 and d * T <= 512]
    bchunk = max(fitting) if fitting else 1
    nchunks = B // bchunk

    y = pl.pallas_call(
        fused_duration_kernel,
        out_shape=jax.ShapeDtypeStruct((B * T, 1), jnp.float32),
        grid=(nchunks,),
        in_specs=[
            pl.BlockSpec((bchunk, T, C), lambda i: (i, 0, 0)),          # x (batch chunk)
            pl.BlockSpec((L, bchunk * T, 2 * C), lambda i: (0, i, 0)),  # CLN gamma/beta
            pl.BlockSpec((L * K, C, C), lambda i: (0, 0, 0)),           # conv weights
            pl.BlockSpec((L, C), lambda i: (0, 0)),                     # conv bias
            pl.BlockSpec((L, C), lambda i: (0, 0)),                     # LN gamma
            pl.BlockSpec((L, C), lambda i: (0, 0)),                     # LN beta
            pl.BlockSpec((1, C), lambda i: (0, 0)),                     # final conv weight
            pl.BlockSpec((1, 1), lambda i: (0, 0)),                     # final conv bias
        ],
        out_specs=pl.BlockSpec((bchunk * T, 1), lambda i: (i, 0)),
        scratch_shapes=[
            pltpu.VMEM((bchunk, T + K - 1, C), compute_dtype),   # zero-haloed activations
        ],
        compiler_params=pltpu.CompilerParams(
            dimension_semantics=("parallel",)),                  # chunks -> both TCs on v7x
    )(x, gb_rows, Wc, bconv, lg, lb, wf, bf)

    return y.reshape(B, 1, T)                                    # [B, 1, Ntext]


# ----------------------------------------------------------------------------
# Pure-JAX f32 reference (module semantics, HIGHEST-precision matmuls)
# ----------------------------------------------------------------------------
def reference(phoneme_features, style_embedding, params):
    hp = jax.lax.Precision.HIGHEST
    x = jnp.transpose(phoneme_features, (0, 2, 1))
    s = jnp.mean(style_embedding, axis=2)                   # [B, S]
    B, T, _ = x.shape
    for layer in params["layers"]:
        w = layer["conv_w"]
        K, _, cout = w.shape
        pad = K // 2
        xpad = jnp.pad(x, ((0, 0), (pad, pad), (0, 0)))
        acc = jnp.broadcast_to(layer["conv_b"][None], (B, T, cout))
        for k in range(K):
            acc = acc + jnp.einsum("btc,cd->btd", xpad[:, k:k + T, :], w[k], precision=hp)
        h = jnp.maximum(acc, 0.0)
        mu = jnp.mean(h, -1, keepdims=True)
        var = jnp.mean(jnp.square(h - mu), -1, keepdims=True)
        h = (h - mu) * jax.lax.rsqrt(var + _EPS)
        h = h * layer["ln_g"][None] + layer["ln_b"][None]
        gbv = jnp.dot(s, layer["cln_w"], precision=hp) + layer["cln_b"]
        gamma, beta = gbv[:, :cout], gbv[:, cout:]
        mu2 = jnp.mean(h, -1, keepdims=True)
        var2 = jnp.mean(jnp.square(h - mu2), -1, keepdims=True)
        hn = (h - mu2) * jax.lax.rsqrt(var2 + _EPS)
        x = (1.0 + gamma[:, None, :]) * hn + beta[:, None, :]
    y = jnp.einsum("btc,cd->btd", x, params["final_w"], precision=hp) + params["final_b"][None]
    return jnp.transpose(jnp.maximum(y, 0.0), (0, 2, 1))


# ----------------------------------------------------------------------------
# Deterministic synthetic parameter init (shapes implied by __init__)
# NOTE: real PyTorch Conv1d checkpoints store weight as (Cout, Cin, K); when
# importing, transpose to (K, Cin, Cout) = weight.permute(2, 1, 0).
# ----------------------------------------------------------------------------
def init_params(key, conv_in, conv_mid, conv_out, kernel_size, style_dim, n_convs):
    layers = []
    for i in range(n_convs):
        cin = conv_in if i == 0 else conv_mid
        cout = conv_out if i == n_convs - 1 else conv_mid
        key, k0, k1, k2, k3, k4, k5 = jax.random.split(key, 7)
        layers.append(dict(
            conv_w=jax.random.normal(k0, (kernel_size, cin, cout), jnp.float32)
            * (1.0 / (cin * kernel_size) ** 0.5),
            conv_b=0.01 * jax.random.normal(k1, (1, cout), jnp.float32),
            ln_g=1.0 + 0.1 * jax.random.normal(k2, (1, cout), jnp.float32),
            ln_b=0.1 * jax.random.normal(k3, (1, cout), jnp.float32),
            cln_w=jax.random.normal(k4, (style_dim, 2 * cout), jnp.float32)
            * (1.0 / style_dim ** 0.5),
            cln_b=0.01 * jax.random.normal(k5, (1, 2 * cout), jnp.float32),
        ))
    key, kf0, kf1 = jax.random.split(key, 3)
    final_w = jax.random.normal(kf0, (conv_out, 1), jnp.float32) * (1.0 / conv_out ** 0.5)
    final_b = 0.01 * jax.random.normal(kf1, (1, 1), jnp.float32)
    return dict(layers=layers, final_w=final_w, final_b=final_b)


if __name__ == "__main__":
    # Small config consistent with the module docstring (channels/style_dim = 128).
    B = 2
    conv_channels = 128        # conv_in = conv_middle = conv_out
    conv_kernel_size = 3
    conv_stride = 1            # see TODO(synk) above
    style_dim = 128
    n_convs = 2
    Ntext = 16                 # phoneme time steps
    Nstyle = 8                 # style time steps

    key = jax.random.PRNGKey(0)
    kx, ks, kp = jax.random.split(key, 3)
    phoneme_features = jax.random.normal(kx, (B, conv_channels, Ntext), jnp.float32)
    style_embedding = jax.random.normal(ks, (B, style_dim, Nstyle), jnp.float32)
    params = init_params(kp, conv_channels, conv_channels, conv_channels,
                         conv_kernel_size, style_dim, n_convs)

    ref = reference(phoneme_features, style_embedding, params)

    # 1) Semantics check: f32 matmul path, tight tolerance (small slack for MXU
    #    f32 pass differences and one-pass vs two-pass LN statistics).
    out_f32 = jax.block_until_ready(
        duration_predictor(phoneme_features, style_embedding, params,
                           compute_dtype=jnp.float32))
    assert out_f32.shape == (B, 1, Ntext), out_f32.shape
    assert jnp.allclose(out_f32, ref, atol=2e-3, rtol=2e-3), \
        float(jnp.max(jnp.abs(out_f32 - ref)))

    # 2) Production path: bf16 MXU inputs with f32 accumulation / f32 LN math.
    #    Looser tolerance is expected from bf16 matmul operands (~1% relative).
    out_bf16 = jax.block_until_ready(
        duration_predictor(phoneme_features, style_embedding, params,
                           compute_dtype=jnp.bfloat16))
    assert out_bf16.shape == (B, 1, Ntext), out_bf16.shape
    assert jnp.allclose(out_bf16, ref, atol=5e-2, rtol=5e-2), \
        float(jnp.max(jnp.abs(out_bf16 - ref)))

    print("KERNEL_OK")
</pallas_src>

<mosaic_0001>
module attributes {stable_mosaic.version = 11 : i64} {
  func.func @fused_duration_kernel(%arg0: i32, %arg1: memref<2x16x128xf32, #tpu.memory_space<vmem>>, %arg2: memref<2x32x256xf32, #tpu.memory_space<vmem>>, %arg3: memref<6x128x128xf32, #tpu.memory_space<vmem>>, %arg4: memref<2x128xf32, #tpu.memory_space<vmem>>, %arg5: memref<2x128xf32, #tpu.memory_space<vmem>>, %arg6: memref<2x128xf32, #tpu.memory_space<vmem>>, %arg7: memref<1x128xf32, #tpu.memory_space<vmem>>, %arg8: memref<1x1xf32, #tpu.memory_space<vmem>>, %arg9: memref<32x1xf32, #tpu.memory_space<vmem>>, %arg10: memref<2x18x128xf32, #tpu.memory_space<vmem>>) attributes {dimension_semantics = [#tpu.dimension_semantics<parallel>], iteration_bounds = array<i64: 1>, scalar_prefetch = 0 : i64, scratch_operands = 1 : i64, tpu.core_type = #tpu.core_type<tc>, window_params = [{transform_indices = @transform_0, window_bounds = array<i64: 2, 16, 128>}, {transform_indices = @transform_1, window_bounds = array<i64: 2, 32, 256>}, {pipeline_mode = #tpu.pipeline_mode<synchronous>, transform_indices = @transform_2, window_bounds = array<i64: 6, 128, 128>}, {pipeline_mode = #tpu.pipeline_mode<synchronous>, transform_indices = @transform_3, window_bounds = array<i64: 2, 128>}, {pipeline_mode = #tpu.pipeline_mode<synchronous>, transform_indices = @transform_4, window_bounds = array<i64: 2, 128>}, {pipeline_mode = #tpu.pipeline_mode<synchronous>, transform_indices = @transform_5, window_bounds = array<i64: 2, 128>}, {pipeline_mode = #tpu.pipeline_mode<synchronous>, transform_indices = @transform_6, window_bounds = array<i64: 1, 128>}, {pipeline_mode = #tpu.pipeline_mode<synchronous>, transform_indices = @transform_7, window_bounds = array<i64: 1, 1>}, {transform_indices = @transform_8, window_bounds = array<i64: 32, 1>}]} {
    %cst = arith.constant 0.000000e+00 : f32
    %0 = vector.broadcast %cst : f32 to vector<2x1x128xf32>
    %c0 = arith.constant 0 : index
    %c0_0 = arith.constant 0 : index
    %c0_1 = arith.constant 0 : index
    %1 = vector.load %arg10[%c0, %c0_0, %c0_1] : memref<2x18x128xf32, #tpu.memory_space<vmem>>, vector<2x1x128xf32>
    tpu.vector_store %arg10[%c0, %c0_0, %c0_1], %0 {strides = array<i32>} : memref<2x18x128xf32, #tpu.memory_space<vmem>>, vector<2x1x128xf32>,
    %cst_2 = arith.constant 0.000000e+00 : f32
    %2 = vector.broadcast %cst_2 : f32 to vector<2x1x128xf32>
    %c0_3 = arith.constant 0 : index
    %c17 = arith.constant 17 : index
    %c0_4 = arith.constant 0 : index
    %3 = vector.load %arg10[%c0_3, %c17, %c0_4] : memref<2x18x128xf32, #tpu.memory_space<vmem>>, vector<2x1x128xf32>
    tpu.vector_store %arg10[%c0_3, %c17, %c0_4], %2 {strides = array<i32>} : memref<2x18x128xf32, #tpu.memory_space<vmem>>, vector<2x1x128xf32>,
    %c0_5 = arith.constant 0 : index
    %c0_6 = arith.constant 0 : index
    %c0_7 = arith.constant 0 : index
    %4 = vector.load %arg1[%c0_5, %c0_6, %c0_7] : memref<2x16x128xf32, #tpu.memory_space<vmem>>, vector<2x16x128xf32>
    %5 = vector.shape_cast %4 : vector<2x16x128xf32> to vector<32x128xf32>
    %6 = vector.shape_cast %5 : vector<32x128xf32> to vector<2x16x128xf32>
    %c0_8 = arith.constant 0 : index
    %c1 = arith.constant 1 : index
    %c0_9 = arith.constant 0 : index
    %7 = vector.load %arg10[%c0_8, %c1, %c0_9] : memref<2x18x128xf32, #tpu.memory_space<vmem>>, vector<2x16x128xf32>
    tpu.vector_store %arg10[%c0_8, %c1, %c0_9], %6 {strides = array<i32>} : memref<2x18x128xf32, #tpu.memory_space<vmem>>, vector<2x16x128xf32>,
    %c0_10 = arith.constant 0 : index
    %c0_11 = arith.constant 0 : index
    %8 = vector.load %arg4[%c0_10, %c0_11] : memref<2x128xf32, #tpu.memory_space<vmem>>, vector<1x128xf32>
    %c0_12 = arith.constant 0 : index
    %c0_13 = arith.constant 0 : index
    %c0_14 = arith.constant 0 : index
    %9 = vector.load %arg10[%c0_12, %c0_13, %c0_14] : memref<2x18x128xf32, #tpu.memory_space<vmem>>, vector<2x16x128xf32>
    %10 = vector.shape_cast %9 : vector<2x16x128xf32> to vector<32x128xf32>
    %c0_15 = arith.constant 0 : index
    %c0_16 = arith.constant 0 : index
    %c0_17 = arith.constant 0 : index
    %11 = vector.load %arg3[%c0_15, %c0_16, %c0_17] : memref<6x128x128xf32, #tpu.memory_space<vmem>>, vector<1x128x128xf32>
    %12 = vector.shape_cast %11 : vector<1x128x128xf32> to vector<128x128xf32>
    %cst_18 = arith.constant dense<0.000000e+00> : vector<32x128xf32>
    %13 = tpu.matmul %10, %12, %cst_18 {dimension_numbers = #tpu.dot_dimension_numbers<[1], [0], [0], [1], [0, 0, 1, 1], [], []>} : vector<32x128xf32>, vector<128x128xf32>, vector<32x128xf32> -> vector<32x128xf32>
    %14 = vector.broadcast %8 : vector<1x128xf32> to vector<32x128xf32>
    %15 = arith.addf %14, %13 : vector<32x128xf32>
    %c0_19 = arith.constant 0 : index
    %c1_20 = arith.constant 1 : index
    %c0_21 = arith.constant 0 : index
    %16 = vector.load %arg10[%c0_19, %c1_20, %c0_21] : memref<2x18x128xf32, #tpu.memory_space<vmem>>, vector<2x16x128xf32>
    %17 = vector.shape_cast %16 : vector<2x16x128xf32> to vector<32x128xf32>
    %c1_22 = arith.constant 1 : index
    %c0_23 = arith.constant 0 : index
    %c0_24 = arith.constant 0 : index
    %18 = vector.load %arg3[%c1_22, %c0_23, %c0_24] : memref<6x128x128xf32, #tpu.memory_space<vmem>>, vector<1x128x128xf32>
    %19 = vector.shape_cast %18 : vector<1x128x128xf32> to vector<128x128xf32>
    %cst_25 = arith.constant dense<0.000000e+00> : vector<32x128xf32>
    %20 = tpu.matmul %17, %19, %cst_25 {dimension_numbers = #tpu.dot_dimension_numbers<[1], [0], [0], [1], [0, 0, 1, 1], [], []>} : vector<32x128xf32>, vector<128x128xf32>, vector<32x128xf32> -> vector<32x128xf32>
    %21 = arith.addf %15, %20 : vector<32x128xf32>
    %c0_26 = arith.constant 0 : index
    %c2 = arith.constant 2 : index
    %c0_27 = arith.constant 0 : index
    %22 = vector.load %arg10[%c0_26, %c2, %c0_27] : memref<2x18x128xf32, #tpu.memory_space<vmem>>, vector<2x16x128xf32>
    %23 = vector.shape_cast %22 : vector<2x16x128xf32> to vector<32x128xf32>
    %c2_28 = arith.constant 2 : index
    %c0_29 = arith.constant 0 : index
    %c0_30 = arith.constant 0 : index
    %24 = vector.load %arg3[%c2_28, %c0_29, %c0_30] : memref<6x128x128xf32, #tpu.memory_space<vmem>>, vector<1x128x128xf32>
    %25 = vector.shape_cast %24 : vector<1x128x128xf32> to vector<128x128xf32>
    %cst_31 = arith.constant dense<0.000000e+00> : vector<32x128xf32>
    %26 = tpu.matmul %23, %25, %cst_31 {dimension_numbers = #tpu.dot_dimension_numbers<[1], [0], [0], [1], [0, 0, 1, 1], [], []>} : vector<32x128xf32>, vector<128x128xf32>, vector<32x128xf32> -> vector<32x128xf32>
    %27 = arith.addf %21, %26 : vector<32x128xf32>
    %cst_32 = arith.constant 0.000000e+00 : f32
    %28 = vector.broadcast %cst_32 : f32 to vector<32x128xf32>
    %29 = arith.maximumf %27, %28 : vector<32x128xf32>
    %cst_33 = arith.constant dense<0.000000e+00> : vector<32xf32>
    %30 = vector.multi_reduction <add>, %29, %cst_33 [1] : vector<32x128xf32> to vector<32xf32>
    %31 = vector.shape_cast %30 : vector<32xf32> to vector<32x1xf32>
    %cst_34 = arith.constant 7.812500e-03 : f32
    %32 = vector.broadcast %cst_34 : f32 to vector<32x1xf32>
    %33 = arith.mulf %31, %32 : vector<32x1xf32>
    %34 = arith.mulf %29, %29 : vector<32x128xf32>
    %cst_35 = arith.constant dense<0.000000e+00> : vector<32xf32>
    %35 = vector.multi_reduction <add>, %34, %cst_35 [1] : vector<32x128xf32> to vector<32xf32>
    %36 = vector.shape_cast %35 : vector<32xf32> to vector<32x1xf32>
    %cst_36 = arith.constant 7.812500e-03 : f32
    %37 = vector.broadcast %cst_36 : f32 to vector<32x1xf32>
    %38 = arith.mulf %36, %37 : vector<32x1xf32>
    %39 = arith.mulf %33, %33 : vector<32x1xf32>
    %40 = arith.subf %38, %39 : vector<32x1xf32>
    %cst_37 = arith.constant 0.000000e+00 : f32
    %41 = vector.broadcast %cst_37 : f32 to vector<32x1xf32>
    %42 = arith.maximumf %40, %41 : vector<32x1xf32>
    %43 = vector.broadcast %33 : vector<32x1xf32> to vector<32x128xf32>
    %44 = arith.subf %29, %43 : vector<32x128xf32>
    %cst_38 = arith.constant 9.99999974E-6 : f32
    %45 = vector.broadcast %cst_38 : f32 to vector<32x1xf32>
    %46 = arith.addf %42, %45 : vector<32x1xf32>
    %47 = math.rsqrt %46 : vector<32x1xf32>
    %48 = vector.broadcast %47 : vector<32x1xf32> to vector<32x128xf32>
    %49 = arith.mulf %44, %48 : vector<32x128xf32>
    %c0_39 = arith.constant 0 : index
    %c0_40 = arith.constant 0 : index
    %50 = vector.load %arg5[%c0_39, %c0_40] : memref<2x128xf32, #tpu.memory_space<vmem>>, vector<1x128xf32>
    %51 = vector.broadcast %50 : vector<1x128xf32> to vector<32x128xf32>
    %52 = arith.mulf %49, %51 : vector<32x128xf32>
    %c0_41 = arith.constant 0 : index
    %c0_42 = arith.constant 0 : index
    %53 = vector.load %arg6[%c0_41, %c0_42] : memref<2x128xf32, #tpu.memory_space<vmem>>, vector<1x128xf32>
    %54 = vector.broadcast %53 : vector<1x128xf32> to vector<32x128xf32>
    %55 = arith.addf %52, %54 : vector<32x128xf32>
    %cst_43 = arith.constant dense<0.000000e+00> : vector<32xf32>
    %56 = vector.multi_reduction <add>, %55, %cst_43 [1] : vector<32x128xf32> to vector<32xf32>
    %57 = vector.shape_cast %56 : vector<32xf32> to vector<32x1xf32>
    %cst_44 = arith.constant 7.812500e-03 : f32
    %58 = vector.broadcast %cst_44 : f32 to vector<32x1xf32>
    %59 = arith.mulf %57, %58 : vector<32x1xf32>
    %60 = arith.mulf %55, %55 : vector<32x128xf32>
    %cst_45 = arith.constant dense<0.000000e+00> : vector<32xf32>
    %61 = vector.multi_reduction <add>, %60, %cst_45 [1] : vector<32x128xf32> to vector<32xf32>
    %62 = vector.shape_cast %61 : vector<32xf32> to vector<32x1xf32>
    %cst_46 = arith.constant 7.812500e-03 : f32
    %63 = vector.broadcast %cst_46 : f32 to vector<32x1xf32>
    %64 = arith.mulf %62, %63 : vector<32x1xf32>
    %65 = arith.mulf %59, %59 : vector<32x1xf32>
    %66 = arith.subf %64, %65 : vector<32x1xf32>
    %cst_47 = arith.constant 0.000000e+00 : f32
    %67 = vector.broadcast %cst_47 : f32 to vector<32x1xf32>
    %68 = arith.maximumf %66, %67 : vector<32x1xf32>
    %69 = vector.broadcast %59 : vector<32x1xf32> to vector<32x128xf32>
    %70 = arith.subf %55, %69 : vector<32x128xf32>
    %cst_48 = arith.constant 9.99999974E-6 : f32
    %71 = vector.broadcast %cst_48 : f32 to vector<32x1xf32>
    %72 = arith.addf %68, %71 : vector<32x1xf32>
    %73 = math.rsqrt %72 : vector<32x1xf32>
    %74 = vector.broadcast %73 : vector<32x1xf32> to vector<32x128xf32>
    %75 = arith.mulf %70, %74 : vector<32x128xf32>
    %c0_49 = arith.constant 0 : index
    %c0_50 = arith.constant 0 : index
    %c0_51 = arith.constant 0 : index
    %76 = vector.load %arg2[%c0_49, %c0_50, %c0_51] : memref<2x32x256xf32, #tpu.memory_space<vmem>>, vector<1x32x128xf32>
    %77 = vector.shape_cast %76 : vector<1x32x128xf32> to vector<32x128xf32>
    %c0_52 = arith.constant 0 : index
    %c0_53 = arith.constant 0 : index
    %c128 = arith.constant 128 : index
    %78 = vector.load %arg2[%c0_52, %c0_53, %c128] : memref<2x32x256xf32, #tpu.memory_space<vmem>>, vector<1x32x128xf32>
    %79 = vector.shape_cast %78 : vector<1x32x128xf32> to vector<32x128xf32>
    %cst_54 = arith.constant 1.000000e+00 : f32
    %80 = vector.broadcast %cst_54 : f32 to vector<32x128xf32>
    %81 = arith.addf %80, %77 : vector<32x128xf32>
    %82 = arith.mulf %81, %75 : vector<32x128xf32>
    %83 = arith.addf %82, %79 : vector<32x128xf32>
    %84 = vector.shape_cast %83 : vector<32x128xf32> to vector<2x16x128xf32>
    %c0_55 = arith.constant 0 : index
    %c1_56 = arith.constant 1 : index
    %c0_57 = arith.constant 0 : index
    %85 = vector.load %arg10[%c0_55, %c1_56, %c0_57] : memref<2x18x128xf32, #tpu.memory_space<vmem>>, vector<2x16x128xf32>
    tpu.vector_store %arg10[%c0_55, %c1_56, %c0_57], %84 {strides = array<i32>} : memref<2x18x128xf32, #tpu.memory_space<vmem>>, vector<2x16x128xf32>,
    %c1_58 = arith.constant 1 : index
    %c0_59 = arith.constant 0 : index
    %86 = vector.load %arg4[%c1_58, %c0_59] : memref<2x128xf32, #tpu.memory_space<vmem>>, vector<1x128xf32>
    %c0_60 = arith.constant 0 : index
    %c0_61 = arith.constant 0 : index
    %c0_62 = arith.constant 0 : index
    %87 = vector.load %arg10[%c0_60, %c0_61, %c0_62] : memref<2x18x128xf32, #tpu.memory_space<vmem>>, vector<2x16x128xf32>
    %88 = vector.shape_cast %87 : vector<2x16x128xf32> to vector<32x128xf32>
    %c3 = arith.constant 3 : index
    %c0_63 = arith.constant 0 : index
    %c0_64 = arith.constant 0 : index
    %89 = vector.load %arg3[%c3, %c0_63, %c0_64] : memref<6x128x128xf32, #tpu.memory_space<vmem>>, vector<1x128x128xf32>
    %90 = vector.shape_cast %89 : vector<1x128x128xf32> to vector<128x128xf32>
    %cst_65 = arith.constant dense<0.000000e+00> : vector<32x128xf32>
    %91 = tpu.matmul %88, %90, %cst_65 {dimension_numbers = #tpu.dot_dimension_numbers<[1], [0], [0], [1], [0, 0, 1, 1], [], []>} : vector<32x128xf32>, vector<128x128xf32>, vector<32x128xf32> -> vector<32x128xf32>
    %92 = vector.broadcast %86 : vector<1x128xf32> to vector<32x128xf32>
    %93 = arith.addf %92, %91 : vector<32x128xf32>
    %c0_66 = arith.constant 0 : index
    %c1_67 = arith.constant 1 : index
    %c0_68 = arith.constant 0 : index
    %94 = vector.load %arg10[%c0_66, %c1_67, %c0_68] : memref<2x18x128xf32, #tpu.memory_space<vmem>>, vector<2x16x128xf32>
    %95 = vector.shape_cast %94 : vector<2x16x128xf32> to vector<32x128xf32>
    %c4 = arith.constant 4 : index
    %c0_69 = arith.constant 0 : index
    %c0_70 = arith.constant 0 : index
    %96 = vector.load %arg3[%c4, %c0_69, %c0_70] : memref<6x128x128xf32, #tpu.memory_space<vmem>>, vector<1x128x128xf32>
    %97 = vector.shape_cast %96 : vector<1x128x128xf32> to vector<128x128xf32>
    %cst_71 = arith.constant dense<0.000000e+00> : vector<32x128xf32>
    %98 = tpu.matmul %95, %97, %cst_71 {dimension_numbers = #tpu.dot_dimension_numbers<[1], [0], [0], [1], [0, 0, 1, 1], [], []>} : vector<32x128xf32>, vector<128x128xf32>, vector<32x128xf32> -> vector<32x128xf32>
    %99 = arith.addf %93, %98 : vector<32x128xf32>
    %c0_72 = arith.constant 0 : index
    %c2_73 = arith.constant 2 : index
    %c0_74 = arith.constant 0 : index
    %100 = vector.load %arg10[%c0_72, %c2_73, %c0_74] : memref<2x18x128xf32, #tpu.memory_space<vmem>>, vector<2x16x128xf32>
    %101 = vector.shape_cast %100 : vector<2x16x128xf32> to vector<32x128xf32>
    %c5 = arith.constant 5 : index
    %c0_75 = arith.constant 0 : index
    %c0_76 = arith.constant 0 : index
    %102 = vector.load %arg3[%c5, %c0_75, %c0_76] : memref<6x128x128xf32, #tpu.memory_space<vmem>>, vector<1x128x128xf32>
    %103 = vector.shape_cast %102 : vector<1x128x128xf32> to vector<128x128xf32>
    %cst_77 = arith.constant dense<0.000000e+00> : vector<32x128xf32>
    %104 = tpu.matmul %101, %103, %cst_77 {dimension_numbers = #tpu.dot_dimension_numbers<[1], [0], [0], [1], [0, 0, 1, 1], [], []>} : vector<32x128xf32>, vector<128x128xf32>, vector<32x128xf32> -> vector<32x128xf32>
    %105 = arith.addf %99, %104 : vector<32x128xf32>
    %cst_78 = arith.constant 0.000000e+00 : f32
    %106 = vector.broadcast %cst_78 : f32 to vector<32x128xf32>
    %107 = arith.maximumf %105, %106 : vector<32x128xf32>
    %cst_79 = arith.constant dense<0.000000e+00> : vector<32xf32>
    %108 = vector.multi_reduction <add>, %107, %cst_79 [1] : vector<32x128xf32> to vector<32xf32>
    %109 = vector.shape_cast %108 : vector<32xf32> to vector<32x1xf32>
    %cst_80 = arith.constant 7.812500e-03 : f32
    %110 = vector.broadcast %cst_80 : f32 to vector<32x1xf32>
    %111 = arith.mulf %109, %110 : vector<32x1xf32>
    %112 = arith.mulf %107, %107 : vector<32x128xf32>
    %cst_81 = arith.constant dense<0.000000e+00> : vector<32xf32>
    %113 = vector.multi_reduction <add>, %112, %cst_81 [1] : vector<32x128xf32> to vector<32xf32>
    %114 = vector.shape_cast %113 : vector<32xf32> to vector<32x1xf32>
    %cst_82 = arith.constant 7.812500e-03 : f32
    %115 = vector.broadcast %cst_82 : f32 to vector<32x1xf32>
    %116 = arith.mulf %114, %115 : vector<32x1xf32>
    %117 = arith.mulf %111, %111 : vector<32x1xf32>
    %118 = arith.subf %116, %117 : vector<32x1xf32>
    %cst_83 = arith.constant 0.000000e+00 : f32
    %119 = vector.broadcast %cst_83 : f32 to vector<32x1xf32>
    %120 = arith.maximumf %118, %119 : vector<32x1xf32>
    %121 = vector.broadcast %111 : vector<32x1xf32> to vector<32x128xf32>
    %122 = arith.subf %107, %121 : vector<32x128xf32>
    %cst_84 = arith.constant 9.99999974E-6 : f32
    %123 = vector.broadcast %cst_84 : f32 to vector<32x1xf32>
    %124 = arith.addf %120, %123 : vector<32x1xf32>
    %125 = math.rsqrt %124 : vector<32x1xf32>
    %126 = vector.broadcast %125 : vector<32x1xf32> to vector<32x128xf32>
    %127 = arith.mulf %122, %126 : vector<32x128xf32>
    %c1_85 = arith.constant 1 : index
    %c0_86 = arith.constant 0 : index
    %128 = vector.load %arg5[%c1_85, %c0_86] : memref<2x128xf32, #tpu.memory_space<vmem>>, vector<1x128xf32>
    %129 = vector.broadcast %128 : vector<1x128xf32> to vector<32x128xf32>
    %130 = arith.mulf %127, %129 : vector<32x128xf32>
    %c1_87 = arith.constant 1 : index
    %c0_88 = arith.constant 0 : index
    %131 = vector.load %arg6[%c1_87, %c0_88] : memref<2x128xf32, #tpu.memory_space<vmem>>, vector<1x128xf32>
    %132 = vector.broadcast %131 : vector<1x128xf32> to vector<32x128xf32>
    %133 = arith.addf %130, %132 : vector<32x128xf32>
    %cst_89 = arith.constant dense<0.000000e+00> : vector<32xf32>
    %134 = vector.multi_reduction <add>, %133, %cst_89 [1] : vector<32x128xf32> to vector<32xf32>
    %135 = vector.shape_cast %134 : vector<32xf32> to vector<32x1xf32>
    %cst_90 = arith.constant 7.812500e-03 : f32
    %136 = vector.broadcast %cst_90 : f32 to vector<32x1xf32>
    %137 = arith.mulf %135, %136 : vector<32x1xf32>
    %138 = arith.mulf %133, %133 : vector<32x128xf32>
    %cst_91 = arith.constant dense<0.000000e+00> : vector<32xf32>
    %139 = vector.multi_reduction <add>, %138, %cst_91 [1] : vector<32x128xf32> to vector<32xf32>
    %140 = vector.shape_cast %139 : vector<32xf32> to vector<32x1xf32>
    %cst_92 = arith.constant 7.812500e-03 : f32
    %141 = vector.broadcast %cst_92 : f32 to vector<32x1xf32>
    %142 = arith.mulf %140, %141 : vector<32x1xf32>
    %143 = arith.mulf %137, %137 : vector<32x1xf32>
    %144 = arith.subf %142, %143 : vector<32x1xf32>
    %cst_93 = arith.constant 0.000000e+00 : f32
    %145 = vector.broadcast %cst_93 : f32 to vector<32x1xf32>
    %146 = arith.maximumf %144, %145 : vector<32x1xf32>
    %147 = vector.broadcast %137 : vector<32x1xf32> to vector<32x128xf32>
    %148 = arith.subf %133, %147 : vector<32x128xf32>
    %cst_94 = arith.constant 9.99999974E-6 : f32
    %149 = vector.broadcast %cst_94 : f32 to vector<32x1xf32>
    %150 = arith.addf %146, %149 : vector<32x1xf32>
    %151 = math.rsqrt %150 : vector<32x1xf32>
    %152 = vector.broadcast %151 : vector<32x1xf32> to vector<32x128xf32>
    %153 = arith.mulf %148, %152 : vector<32x128xf32>
    %c1_95 = arith.constant 1 : index
    %c0_96 = arith.constant 0 : index
    %c0_97 = arith.constant 0 : index
    %154 = vector.load %arg2[%c1_95, %c0_96, %c0_97] : memref<2x32x256xf32, #tpu.memory_space<vmem>>, vector<1x32x128xf32>
    %155 = vector.shape_cast %154 : vector<1x32x128xf32> to vector<32x128xf32>
    %c1_98 = arith.constant 1 : index
    %c0_99 = arith.constant 0 : index
    %c128_100 = arith.constant 128 : index
    %156 = vector.load %arg2[%c1_98, %c0_99, %c128_100] : memref<2x32x256xf32, #tpu.memory_space<vmem>>, vector<1x32x128xf32>
    %157 = vector.shape_cast %156 : vector<1x32x128xf32> to vector<32x128xf32>
    %cst_101 = arith.constant 1.000000e+00 : f32
    %158 = vector.broadcast %cst_101 : f32 to vector<32x128xf32>
    %159 = arith.addf %158, %155 : vector<32x128xf32>
    %160 = arith.mulf %159, %153 : vector<32x128xf32>
    %161 = arith.addf %160, %157 : vector<32x128xf32>
    %c0_102 = arith.constant 0 : index
    %c0_103 = arith.constant 0 : index
    %162 = vector.load %arg7[%c0_102, %c0_103] : memref<1x128xf32, #tpu.memory_space<vmem>>, vector<1x128xf32>
    %163 = vector.broadcast %162 : vector<1x128xf32> to vector<32x128xf32>
    %164 = arith.mulf %161, %163 : vector<32x128xf32>
    %cst_104 = arith.constant dense<0.000000e+00> : vector<32xf32>
    %165 = vector.multi_reduction <add>, %164, %cst_104 [1] : vector<32x128xf32> to vector<32xf32>
    %166 = vector.shape_cast %165 : vector<32xf32> to vector<32x1xf32>
    %c0_105 = arith.constant 0 : index
    %c0_106 = arith.constant 0 : index
    %167 = vector.load %arg8[%c0_105, %c0_106] : memref<1x1xf32, #tpu.memory_space<vmem>>, vector<1x1xf32>
    %168 = vector.broadcast %167 : vector<1x1xf32> to vector<32x1xf32>
    %169 = arith.addf %166, %168 : vector<32x1xf32>
    %cst_107 = arith.constant 0.000000e+00 : f32
    %170 = vector.broadcast %cst_107 : f32 to vector<32x1xf32>
    %171 = arith.maximumf %169, %170 : vector<32x1xf32>
    %c0_108 = arith.constant 0 : index
    %c0_109 = arith.constant 0 : index
    %172 = vector.load %arg9[%c0_108, %c0_109] : memref<32x1xf32, #tpu.memory_space<vmem>>, vector<32x1xf32>
    tpu.vector_store %arg9[%c0_108, %c0_109], %171 {strides = array<i32>} : memref<32x1xf32, #tpu.memory_space<vmem>>, vector<32x1xf32>,
    return
  }
  func.func @transform_0(%arg0: i32) -> (i32, i32, i32) {
    %c0_i32 = arith.constant 0 : i32
    %c0_i32_0 = arith.constant 0 : i32
    %c0_i32_1 = arith.constant 0 : i32
    return %arg0, %c0_i32, %c0_i32_0 : i32, i32, i32
  }
  func.func @transform_1(%arg0: i32) -> (i32, i32, i32) {
    %c0_i32 = arith.constant 0 : i32
    %c0_i32_0 = arith.constant 0 : i32
    %c0_i32_1 = arith.constant 0 : i32
    return %c0_i32, %arg0, %c0_i32_0 : i32, i32, i32
  }
  func.func @transform_2(%arg0: i32) -> (i32, i32, i32) {
    %c0_i32 = arith.constant 0 : i32
    %c0_i32_0 = arith.constant 0 : i32
    %c0_i32_1 = arith.constant 0 : i32
    %c0_i32_2 = arith.constant 0 : i32
    return %c0_i32, %c0_i32_0, %c0_i32_1 : i32, i32, i32
  }
  func.func @transform_3(%arg0: i32) -> (i32, i32) {
    %c0_i32 = arith.constant 0 : i32
    %c0_i32_0 = arith.constant 0 : i32
    %c0_i32_1 = arith.constant 0 : i32
    return %c0_i32, %c0_i32_0 : i32, i32
  }
  func.func @transform_4(%arg0: i32) -> (i32, i32) {
    %c0_i32 = arith.constant 0 : i32
    %c0_i32_0 = arith.constant 0 : i32
    %c0_i32_1 = arith.constant 0 : i32
    return %c0_i32, %c0_i32_0 : i32, i32
  }
  func.func @transform_5(%arg0: i32) -> (i32, i32) {
    %c0_i32 = arith.constant 0 : i32
    %c0_i32_0 = arith.constant 0 : i32
    %c0_i32_1 = arith.constant 0 : i32
    return %c0_i32, %c0_i32_0 : i32, i32
  }
  func.func @transform_6(%arg0: i32) -> (i32, i32) {
    %c0_i32 = arith.constant 0 : i32
    %c0_i32_0 = arith.constant 0 : i32
    %c0_i32_1 = arith.constant 0 : i32
    return %c0_i32, %c0_i32_0 : i32, i32
  }
  func.func @transform_7(%arg0: i32) -> (i32, i32) {
    %c0_i32 = arith.constant 0 : i32
    %c0_i32_0 = arith.constant 0 : i32
    %c0_i32_1 = arith.constant 0 : i32
    return %c0_i32, %c0_i32_0 : i32, i32
  }
  func.func @transform_8(%arg0: i32) -> (i32, i32) {
    %c0_i32 = arith.constant 0 : i32
    %c0_i32_0 = arith.constant 0 : i32
    return %arg0, %c0_i32 : i32, i32
  }
}

</mosaic_0001>

<bundles_post_ra>
// kernel: duration_predictor.1
= control target key start
LH: loop header
LB: loop body
LE: loop exit
PB: predicated region body
PF: predicated region fallthrough
CT: control target
= control target key end

     0   :  { %v1761_v3 = vmov 0.0   ;;  %vm1059_vm0 = vcmask 7168   ;;  %s2295_s2 = inlined_call_operand.vmem [shape: f32[6,128,128], index: 2, kind: input, shape index: {}]   ;;  %s2296_s0 = inlined_call_operand.vmem [shape: f32[2,16,128], index: 0, kind: input, shape index: {}]   ;;  %s2297_s3 = inlined_call_operand.vmem [shape: f32[2,128], index: 3, kind: input, shape index: {}]   ;;  %s2298_s4 = inlined_call_operand.vmem [shape: f32[2,128], index: 4, kind: input, shape index: {}]   ;;  %s2299_s5 = inlined_call_operand.vmem [shape: f32[2,128], index: 5, kind: input, shape index: {}]   ;;  %s2300_s1 = inlined_call_operand.vmem [shape: f32[2,32,256], index: 1, kind: input, shape index: {}]   ;;  %s2301_s7 = inlined_call_operand.<no memory space> [shape: f32[1,1], index: 7, kind: input, shape index: {}]   ;;  %s2302_s6 = inlined_call_operand.vmem [shape: f32[1,128], index: 6, kind: input, shape index: {}]   ;;  %s2303_s8 = inlined_call_operand.vmem [shape: f32[32,1], index: 8, kind: output, shape index: {}]  }
   0x1   :  { %v48_v0 = vld [vmem:[%s2295_s2] sm:$0xff]  ;;  %v49_v1 = vld [vmem:[%s2295_s2 + $0x8] sm:$0xff]  ;;  %v50_v2 = vld [vmem:[%s2295_s2 + $0x10] sm:$0xff]  ;;  %31 = vst [vmem:[#allocation2] sm:$0x1] %v1761_v3 }
   0x2   :  { %32 = vst [vmem:[#allocation2 + $0x18] sm:$0x1] %v1761_v3  ;;  %33 = vst [vmem:[#allocation2 + $0x11] sm:$0x1] %v1761_v3  ;;  %v1512_v4 = vpack.c.bf16 %v49_v1, %v48_v0  ;;  %v51_v5 = vld [vmem:[%s2295_s2 + $0x18] sm:$0xff]  ;;  %v52_v7 = vld [vmem:[%s2295_s2 + $0x20] sm:$0xff] }
   0x3   :  { %34 = vst [vmem:[#allocation2 + $0x29] sm:$0x1] %v1761_v3  ;;  %v1516_v6 = vpack.c.bf16 %v51_v5, %v50_v2  ;;  %v53_v8 = vld [vmem:[%s2295_s2 + $0x28] sm:$0xff]  ;;  %v35_v10 = vld [vmem:[%s2296_s0] sm:$0xff]  ;;  %v54_v11 = vld [vmem:[%s2295_s2 + $0x30] sm:$0xff] }
   0x4   :  { %1513 = vmatprep.subr.bf16.mxu0 %v1512_v4  ;;  %v1520_v9 = vpack.c.bf16 %v53_v8, %v52_v7  ;;  %v55_v12 = vld [vmem:[%s2295_s2 + $0x38] sm:$0xff]  ;;  %39 = vst [vmem:[#allocation2 + $0x1] sm:$0xff] %v35_v10  ;;  %v1837_v13 = vld [vmem:[%s2296_s0 + $0x8] sm:$0xff]  ;;  %v56_v15 = vld [vmem:[%s2295_s2 + $0x40] sm:$0xff] }
   0x5   :  { %1515 = vmatpush3.bf16.msra.mxu0 %v1512_v4  ;;  %40 = vst [vmem:[#allocation2 + $0x9] sm:$0xff] %v1837_v13  ;;  %v1524_v14 = vpack.c.bf16 %v55_v12, %v54_v11  ;;  %v57_v16 = vld [vmem:[%s2295_s2 + $0x48] sm:$0xff]  ;;  %v1849_v17 = vld [vmem:[%s2296_s0 + $0x10] sm:$0xff]  ;;  %v1855_v18 = vld [vmem:[%s2296_s0 + $0x18] sm:$0xff] }
   0x6   :  { %1517 = vmatprep.subr.bf16.mxu0 %v1516_v6  ;;  %41 = vst [vmem:[#allocation2 + $0x19] sm:$0xff] %v1849_v17  ;;  %42 = vst [vmem:[#allocation2 + $0x21] sm:$0xff] %v1855_v18  ;;  %v1528_v19 = vpack.c.bf16 %v57_v16, %v56_v15  ;;  %v58_v21 = vld [vmem:[%s2295_s2 + $0x50] sm:$0xff]  ;;  %v59_v22 = vld [vmem:[%s2295_s2 + $0x58] sm:$0xff] }
   0x7   :  { %v1532_v23 = vpack.c.bf16 %v59_v22, %v58_v21  ;;  %v60_v24 = vld [vmem:[%s2295_s2 + $0x60] sm:$0xff]  ;;  %v61_v25 = vld [vmem:[%s2295_s2 + $0x68] sm:$0xff]  ;;  %v62_v27 = vld [vmem:[%s2295_s2 + $0x70] sm:$0xff] }
   0x8   :  { %v1536_v26 = vpack.c.bf16 %v61_v25, %v60_v24  ;;  %v63_v28 = vld [vmem:[%s2295_s2 + $0x78] sm:$0xff]  ;;  %v1069_v30 = vld [vmem:[%s2295_s2 + $0x80] sm:$0xff]  ;;  %v1070_v31 = vld [vmem:[%s2295_s2 + $0x88] sm:$0xff] }
   0x9   :  { %1519 = vmatpush3.bf16.msra.mxu0 %v1516_v6  ;;  %v1540_v29 = vpack.c.bf16 %v63_v28, %v62_v27  ;;  %v1544_v32 = vpack.c.bf16 %v1070_v31, %v1069_v30  ;;  %v1071_v33 = vld [vmem:[%s2295_s2 + $0x90] sm:$0xff]  ;;  %v1072_v34 = vld [vmem:[%s2295_s2 + $0x98] sm:$0xff]  ;;  %v1073_v38 = vld [vmem:[%s2295_s2 + $0xa0] sm:$0xff] }
   0xa   :  { %1521 = vmatprep.subr.bf16.mxu0 %v1520_v9  ;;  %v1548_v36 = vpack.c.bf16 %v1072_v34, %v1071_v33  ;;  %v1074_v39 = vld [vmem:[%s2295_s2 + $0xa8] sm:$0xff]  ;;  %v1075_v42 = vld [vmem:[%s2295_s2 + $0xb0] sm:$0xff]  ;;  %v1076_v43 = vld [vmem:[%s2295_s2 + $0xb8] sm:$0xff] }
   0xb   :  { %v44_v20 = vld [vmem:[#allocation2] sm:$0xff]  ;;  %v1552_v41 = vpack.c.bf16 %v1074_v39, %v1073_v38  ;;  %v1556_v44 = vpack.c.bf16 %v1076_v43, %v1075_v42  ;;  %v1078_v46 = vld [vmem:[%s2295_s2 + $0xc8] sm:$0xff]  ;;  %v1079_v48 = vld [vmem:[%s2295_s2 + $0xd0] sm:$0xff] }
   0xc   :  { %1316 = vmatprep.mubr.f32.mxu0 %v44_v20  ;;  %v45_v35 = vld [vmem:[#allocation2 + $0x8] sm:$0xff]  ;;  %v1077_v45 = vld [vmem:[%s2295_s2 + $0xc0] sm:$0xff]  ;;  %v1080_v49 = vld [vmem:[%s2295_s2 + $0xd8] sm:$0xff] }
   0xd   :  { %1523 = vmatpush3.bf16.msra.mxu0 %v1520_v9  ;;  %v46_v37 = vld [vmem:[#allocation2 + $0x18] sm:$0xff]  ;;  %v47_v40 = vld [vmem:[#allocation2 + $0x20] sm:$0xff]  ;;  %v1560_v47 = vpack.c.bf16 %v1078_v46, %v1077_v45  ;;  %v1564_v50 = vpack.c.bf16 %v1080_v49, %v1079_v48  ;;  %v1082_v52 = vld [vmem:[%s2295_s2 + $0xe8] sm:$0xff] }
   0xe   :  { %1525 = vmatprep.subr.bf16.mxu0 %v1524_v14  ;;  %v1081_v51 = vld [vmem:[%s2295_s2 + $0xe0] sm:$0xff]  ;;  %v1083_v54 = vld [vmem:[%s2295_s2 + $0xf0] sm:$0xff]  ;;  %v1084_v55 = vld [vmem:[%s2295_s2 + $0xf8] sm:$0xff] }
   0xf   :  { %v1568_v53 = vpack.c.bf16 %v1082_v52, %v1081_v51  ;;  %v1572_v56 = vpack.c.bf16 %v1084_v55, %v1083_v54  ;;  %v1085_v57 = vld [vmem:[%s2295_s2 + $0x100] sm:$0xff]  ;;  %v1086_v58 = vld [vmem:[%s2295_s2 + $0x108] sm:$0xff]  ;;  %v1087_v60 = vld [vmem:[%s2295_s2 + $0x110] sm:$0xff] }
  0x10   :  { %v1576_v59 = vpack.c.bf16 %v1086_v58, %v1085_v57  ;;  %v1088_v61 = vld [vmem:[%s2295_s2 + $0x118] sm:$0xff]  ;;  %v1089_v63 = vld [vmem:[%s2295_s2 + $0x120] sm:$0xff]  ;;  %v1090_v0 = vld [vmem:[%s2295_s2 + $0x128] sm:$0xff] }
  0x11   :  { %1527 = vmatpush3.bf16.msra.mxu0 %v1524_v14  ;;  %v1580_v62 = vpack.c.bf16 %v1088_v61, %v1087_v60  ;;  %v1584_v1 = vpack.c.bf16 %v1090_v0, %v1089_v63  ;;  %v267_v2 = vld [vmem:[#allocation2 + $0x2] sm:$0xff]  ;;  %v1091_v3 = vld [vmem:[%s2295_s2 + $0x130] sm:$0xff]  ;;  %v1092_v4 = vld [vmem:[%s2295_s2 + $0x138] sm:$0xff] }
  0x12   :  { %1529 = vmatprep.subr.bf16.mxu0 %v1528_v19  ;;  %v1588_v5 = vpack.c.bf16 %v1092_v4, %v1091_v3  ;;  %v1093_v6 = vld [vmem:[%s2295_s2 + $0x140] sm:$0xff]  ;;  %v1094_v7 = vld [vmem:[%s2295_s2 + $0x148] sm:$0xff]  ;;  %v1095_v9 = vld [vmem:[%s2295_s2 + $0x150] sm:$0xff] }
  0x13   :  { %v1592_v8 = vpack.c.bf16 %v1094_v7, %v1093_v6  ;;  %v1097_v12 = vld [vmem:[%s2295_s2 + $0x160] sm:$0xff]  ;;  %v1099_v15 = vld [vmem:[%s2295_s2 + $0x170] sm:$0xff]  ;;  %v1100_v16 = vld [vmem:[%s2295_s2 + $0x178] sm:$0xff] }
  0x14   :  { %v270_v20 = vld [vmem:[#allocation2 + $0x22] sm:$0xff]  ;;  %v1068_v21 = vld [vmem:[%s2297_s3] ss:$0 sm:$0xff] }
  0x15   :  { %1531 = vmatpush3.bf16.msra.mxu0 %v1528_v19  ;;  %v269_v19 = vld [vmem:[#allocation2 + $0x1a] sm:$0xff] }
  0x16   :  { %1533 = vmatprep.subr.bf16.mxu0 %v1532_v23 }
  0x19   :  { %1535 = vmatpush3.bf16.msra.mxu0 %v1532_v23 }
  0x1a   :  { %1537 = vmatprep.subr.bf16.mxu0 %v1536_v26 }
  0x1d   :  { %1539 = vmatpush3.bf16.msra.mxu0 %v1536_v26 }
  0x1e   :  { %1541 = vmatprep.subr.bf16.mxu0 %v1540_v29 }
  0x21   :  { %1543 = vmatpush3.bf16.msra.mxu0 %v1540_v29 }
  0x22   :  { %1545 = vmatprep.subr.bf16.mxu0 %v1544_v32 }
  0x24   :  { %1317 = vmatmul.mubr.f32.vlgmr.msra.gmra.mrb[0].mxu0 %v45_v35 }
  0x25   :  { %1547 = vmatpush3.bf16.msra.mxu0 %v1544_v32  ;;  %1319 = vmatprep.mubr.f32.mxu0 %v46_v37 }
  0x26   :  { %1549 = vmatprep.subr.bf16.mxu0 %v1548_v36 }
  0x28   :  { %1320 = vmatmul.mubr.f32.gmra.mrb[2].mxu0 %v47_v40 }
  0x29   :  { %1551 = vmatpush3.bf16.msra.mxu0 %v1548_v36  ;;  %1354 = vmatprep.mubr.f32.mxu0 %v35_v10  ;;  %v1096_v10 = vld [vmem:[%s2295_s2 + $0x158] sm:$0xff] }
  0x2a   :  { %1553 = vmatprep.subr.bf16.mxu0 %v1552_v41  ;;  %v1596_v11 = vpack.c.bf16 %v1096_v10, %v1095_v9  ;;  %v1102_v10 = vld [vmem:[%s2299_s5] ss:$0 sm:$0xff] }
  0x2d   :  { %1555 = vmatpush3.bf16.msra.mxu0 %v1552_v41 }
  0x2e   :  { %1557 = vmatprep.subr.bf16.mxu0 %v1556_v44 }
  0x31   :  { %1559 = vmatpush3.bf16.msra.mxu0 %v1556_v44 }
  0x32   :  { %1561 = vmatprep.subr.bf16.mxu0 %v1560_v47 }
  0x35   :  { %1563 = vmatpush3.bf16.msra.mxu0 %v1560_v47 }
  0x36   :  { %1565 = vmatprep.subr.bf16.mxu0 %v1564_v50 }
  0x39   :  { %1567 = vmatpush3.bf16.msra.mxu0 %v1564_v50 }
  0x3a   :  { %1569 = vmatprep.subr.bf16.mxu0 %v1568_v53 }
  0x3d   :  { %1571 = vmatpush3.bf16.msra.mxu0 %v1568_v53 }
  0x3e   :  { %1573 = vmatprep.subr.bf16.mxu0 %v1572_v56 }
  0x41   :  { %1575 = vmatpush3.bf16.msra.mxu0 %v1572_v56 }
  0x42   :  { %1577 = vmatprep.subr.bf16.mxu0 %v1576_v59 }
  0x44   :  { %1355 = vmatmul.mubr.f32.vlgmr.msra.gmra.mrb[0].mxu0 %v1837_v13  ;;  %v1098_v13 = vld [vmem:[%s2295_s2 + $0x168] sm:$0xff] }
  0x45   :  { %1579 = vmatpush3.bf16.msra.mxu0 %v1576_v59  ;;  %1357 = vmatprep.mubr.f32.mxu0 %v1849_v17  ;;  %v1600_v14 = vpack.c.bf16 %v1098_v13, %v1097_v12  ;;  %v1604_v17 = vpack.c.bf16 %v1100_v16, %v1099_v15 }
  0x46   :  { %1581 = vmatprep.subr.bf16.mxu0 %v1580_v62 }
  0x48   :  { %1358 = vmatmul.mubr.f32.gmra.mrb[2].mxu0 %v1855_v18  ;;  %v268_v18 = vld [vmem:[#allocation2 + $0xa] sm:$0xff] }
  0x49   :  { %1583 = vmatpush3.bf16.msra.mxu0 %v1580_v62  ;;  %1392 = vmatprep.mubr.f32.mxu0 %v267_v2 }
  0x4a   :  { %1585 = vmatprep.subr.bf16.mxu0 %v1584_v1 }
  0x4d   :  { %1587 = vmatpush3.bf16.msra.mxu0 %v1584_v1 }
  0x4e   :  { %1589 = vmatprep.subr.bf16.mxu0 %v1588_v5 }
  0x51   :  { %1591 = vmatpush3.bf16.msra.mxu0 %v1588_v5 }
  0x52   :  { %1593 = vmatprep.subr.bf16.mxu0 %v1592_v8 }
  0x55   :  { %1595 = vmatpush3.bf16.msra.mxu0 %v1592_v8  ;;  %v1101_v8 = vld [vmem:[%s2298_s4] ss:$0 sm:$0xff] }
  0x56   :  { %1597 = vmatprep.subr.bf16.mxu0 %v1596_v11 }
  0x59   :  { %1599 = vmatpush3.bf16.msra.mxu0 %v1596_v11 }
  0x5a   :  { %1601 = vmatprep.subr.bf16.mxu0 %v1600_v14 }
  0x5d   :  { %1603 = vmatpush3.bf16.msra.mxu0 %v1600_v14 }
  0x5e   :  { %1605 = vmatprep.subr.bf16.mxu0 %v1604_v17 }
  0x61   :  { %1607 = vmatpush3.bf16.msra.mxu0 %v1604_v17 }
  0x64   :  { %1393 = vmatmul.mubr.f32.vlgmr.msra.gmra.mrb[0].mxu0 %v268_v18 }
  0x65   :  { %1395 = vmatprep.mubr.f32.mxu0 %v269_v19 }
  0x68   :  { %1396 = vmatmul.mubr.f32.gmra.mrb[2].mxu0 %v270_v20 }
 0x137   :  { %v1394_v22 = vpop.f32.mrb[0].mxu0 }
 0x138   :  { %v354_v23 = vpop.f32.mrb[1].mxu0  ;;  %v1704_v24 = vadd.f32 %v1394_v22, %v1068_v21 }
 0x139   :  { %v1705_v25 = vadd.f32 %v1068_v21, %v354_v23 }
 0x13a   :  { %v1978_v29 = vmax.f32 %v1704_v24, 0.0 }
 0x13b   :  { %v377_v26 = vmax.f32 %v1705_v25, 0.0  ;;  %v1397_v27 = vpop.f32.mrb[2].mxu0 }
 0x13c   :  { %v364_v28 = vpop.f32.mrb[3].mxu0  ;;  %v1706_v32 = vadd.f32 %v1397_v27, %v1068_v21  ;;  %v394_v33 = vmul.f32 %v1978_v29, %v1978_v29 }
 0x13d   :  { %381 = vadd.xlane.f32.xlu0 %v377_v26  ;;  %v393_v30 = vmul.f32 %v377_v26, %v377_v26  ;;  %v1707_v31 = vadd.f32 %v1068_v21, %v364_v28 }
 0x13e   :  { %v1985_v35 = vmax.f32 %v1706_v32, 0.0  ;;  %v1103_v32 = vld [vmem:[%s2295_s2 + $0x180] sm:$0xff] }
 0x13f   :  { %397 = vadd.xlane.f32.xlu1 %v393_v30  ;;  %v1983_v34 = vmax.f32 %v1707_v31, 0.0 }
 0x140   :  { %v396_v37 = vmul.f32 %v1985_v35, %v1985_v35 }
 0x141   :  { %383 = vadd.xlane.f32.xlu0 %v1978_v29  ;;  %v395_v36 = vmul.f32 %v1983_v34, %v1983_v34 }
 0x143   :  { %399 = vadd.xlane.f32.xlu1 %v394_v33  ;;  %v1104_v33 = vld [vmem:[%s2295_s2 + $0x188] sm:$0xff] }
 0x145   :  { %385 = vadd.xlane.f32.xlu0 %v1983_v34 }
 0x147   :  { %387 = vadd.xlane.f32.xlu1 %v1985_v35 }
 0x149   :  { %401 = vadd.xlane.f32.xlu0 %v395_v36  ;;  %v1106_v36 = vld [vmem:[%s2295_s2 + $0x198] sm:$0xff] }
 0x14b   :  { %403 = vadd.xlane.f32.xlu1 %v396_v37 }
 0x1ca   :  { %v382_v38 = vpop.xlane.xlu0 %381 }
 0x1cb   :  { %v389_v39 = vmul.f32 0.0078125, %v382_v38  ;;  %v1107_v38 = vld [vmem:[%s2295_s2 + $0x1a0] sm:$0xff] }
 0x1cc   :  { %v398_v40 = vpop.xlane.xlu1 %397 }
 0x1cd   :  { %v409_v41 = vmul.f32 %v389_v39, %v389_v39  ;;  %v405_v42 = vmul.f32 0.0078125, %v398_v40  ;;  %v421_v5 = vsub.f32 %v377_v26, %v389_v39  ;;  %v1108_v39 = vld [vmem:[%s2295_s2 + $0x1a8] sm:$0xff] }
 0x1ce   :  { %v384_v43 = vpop.xlane.xlu0 %383  ;;  %v1616_v40 = vpack.c.bf16 %v1108_v39, %v1107_v38 }
 0x1cf   :  { %v413_v44 = vsub.f32 %v405_v42, %v409_v41  ;;  %v390_v45 = vmul.f32 0.0078125, %v384_v43  ;;  %v1109_v41 = vld [vmem:[%s2295_s2 + $0x1b0] sm:$0xff]  ;;  %v1110_v42 = vld [vmem:[%s2295_s2 + $0x1b8] sm:$0xff] }
 0x1d0   :  { %v400_v46 = vpop.xlane.xlu1 %399  ;;  %v1620_v43 = vpack.c.bf16 %v1110_v42, %v1109_v41 }
 0x1d1   :  { %v417_v47 = vmax.f32 %v413_v44, 0.0  ;;  %v410_v48 = vmul.f32 %v390_v45, %v390_v45  ;;  %v406_v49 = vmul.f32 0.0078125, %v400_v46  ;;  %v422_v11 = vsub.f32 %v1978_v29, %v390_v45  ;;  %v1111_v44 = vld [vmem:[%s2295_s2 + $0x1c0] sm:$0xff]  ;;  %v1112_v45 = vld [vmem:[%s2295_s2 + $0x1c8] sm:$0xff] }
 0x1d2   :  { %v386_v50 = vpop.xlane.xlu0 %385  ;;  %v1624_v46 = vpack.c.bf16 %v1112_v45, %v1111_v44  ;;  %v513_v44 = vld [vmem:[%s2300_s1 + $0x20] sm:$0xff] }
 0x1d3   :  { %v425_v51 = vadd.f32 1e-05, %v417_v47  ;;  %v414_v52 = vsub.f32 %v406_v49, %v410_v48  ;;  %v391_v53 = vmul.f32 0.0078125, %v386_v50  ;;  %v1113_v47 = vld [vmem:[%s2295_s2 + $0x1d0] sm:$0xff]  ;;  %v1114_v48 = vld [vmem:[%s2295_s2 + $0x1d8] sm:$0xff]  ;;  %v1115_v50 = vld [vmem:[%s2295_s2 + $0x1e0] sm:$0xff] }
 0x1d4   :  { %v388_v54 = vpop.xlane.xlu1 %387  ;;  %v1628_v49 = vpack.c.bf16 %v1114_v48, %v1113_v47  ;;  %v521_v48 = vadd.f32 1.0, %v513_v44 }
 0x1d5   :  { %1729 = vrsqrt.f32 %v425_v51  ;;  %v418_v55 = vmax.f32 %v414_v52, 0.0  ;;  %v392_v56 = vmul.f32 0.0078125, %v388_v54  ;;  %v411_v59 = vmul.f32 %v391_v53, %v391_v53  ;;  %v1116_v51 = vld [vmem:[%s2295_s2 + $0x1e8] sm:$0xff]  ;;  %v1118_v54 = vld [vmem:[%s2295_s2 + $0x1f8] sm:$0xff] }
 0x1d6   :  { %v402_v57 = vpop.xlane.xlu0 %401  ;;  %v423_v17 = vsub.f32 %v1983_v34, %v391_v53  ;;  %v1608_v34 = vpack.c.bf16 %v1104_v33, %v1103_v32  ;;  %v1632_v52 = vpack.c.bf16 %v1116_v51, %v1115_v50  ;;  %v1117_v53 = vld [vmem:[%s2295_s2 + $0x1f0] sm:$0xff] }
 0x1d7   :  { %v426_v58 = vadd.f32 1e-05, %v418_v55  ;;  %v407_v60 = vmul.f32 0.0078125, %v402_v57  ;;  %v412_v62 = vmul.f32 %v392_v56, %v392_v56  ;;  %v424_v21 = vsub.f32 %v1985_v35, %v392_v56  ;;  %v1105_v35 = vld [vmem:[%s2295_s2 + $0x190] sm:$0xff]  ;;  %v1120_v56 = vld [vmem:[%s2295_s2 + $0x200] sm:$0xff]  ;;  %v1121_v57 = vld [vmem:[%s2295_s2 + $0x208] sm:$0xff] }
 0x1d8   :  { %v404_v61 = vpop.xlane.xlu1 %403  ;;  %1609 = vmatprep.subr.bf16.mxu1 %v1608_v34  ;;  %v1612_v37 = vpack.c.bf16 %v1106_v36, %v1105_v35  ;;  %v1636_v55 = vpack.c.bf16 %v1118_v54, %v1117_v53  ;;  %v517_v54 = vld [vmem:[%s2300_s1 + $0x28] sm:$0xff] }
 0x1d9   :  { %1731 = vrsqrt.f32 %v426_v58  ;;  %v415_v63 = vsub.f32 %v407_v60, %v411_v59  ;;  %v408_v0 = vmul.f32 0.0078125, %v404_v61  ;;  %1611 = vmatpush3.bf16.msra.mxu1 %v1608_v34  ;;  %v2076_v58 = vpack.c.bf16 %v1121_v57, %v1120_v56  ;;  %v512_v34 = vld [vmem:[%s2300_s1 + $0x10] sm:$0xff]  ;;  %v518_v56 = vld [vmem:[%s2300_s1 + $0x38] sm:$0xff] }
 0x1da   :  { %1613 = vmatprep.subr.bf16.mxu1 %v1612_v37 }
 0x1db   :  { %v419_v1 = vmax.f32 %v415_v63, 0.0  ;;  %v416_v2 = vsub.f32 %v408_v0, %v412_v62 }
 0x1dd   :  { %v427_v3 = vadd.f32 1e-05, %v419_v1  ;;  %v420_v4 = vmax.f32 %v416_v2, 0.0  ;;  %1615 = vmatpush3.bf16.msra.mxu1 %v1612_v37  ;;  %v515_v37 = vld [vmem:[%s2300_s1 + $0x8] sm:$0xff] }
 0x1de   :  { %1617 = vmatprep.subr.bf16.mxu1 %v1616_v40 }
 0x1df   :  { %v1730_v6 = vpop.eup %1729  ;;  %1733 = vrsqrt.f32 %v427_v3  ;;  %v428_v7 = vadd.f32 1e-05, %v420_v4 }
 0x1e0   :  { %v433_v9 = vmul.f32 %v1730_v6, %v421_v5 }
 0x1e1   :  { %1735 = vrsqrt.f32 %v428_v7  ;;  %1619 = vmatpush3.bf16.msra.mxu1 %v1616_v40  ;;  %v520_v40 = vadd.f32 1.0, %v512_v34  ;;  %v1143_v34 = vld [vmem:[%s2295_s2 + $0x2b8] sm:$0xff] }
 0x1e2   :  { %v442_v12 = vmul.f32 %v1101_v8, %v433_v9  ;;  %1621 = vmatprep.subr.bf16.mxu1 %v1620_v43 }
 0x1e3   :  { %v1732_v13 = vpop.eup %1731 }
 0x1e4   :  { %v2000_v14 = vadd.f32 %v1102_v10, %v442_v12  ;;  %v434_v15 = vmul.f32 %v1732_v13, %v422_v11 }
 0x1e5   :  { %1623 = vmatpush3.bf16.msra.mxu1 %v1620_v43  ;;  %v516_v43 = vld [vmem:[%s2300_s1 + $0x18] sm:$0xff] }
 0x1e6   :  { %455 = vadd.xlane.f32.xlu0 %v2000_v14  ;;  %v443_v16 = vmul.f32 %v1101_v8, %v434_v15  ;;  %v467_v19 = vmul.f32 %v2000_v14, %v2000_v14  ;;  %1625 = vmatprep.subr.bf16.mxu1 %v1624_v46 }
 0x1e8   :  { %v2004_v18 = vadd.f32 %v1102_v10, %v443_v16 }
 0x1e9   :  { %v1734_v20 = vpop.eup %1733  ;;  %1627 = vmatpush3.bf16.msra.mxu1 %v1624_v46  ;;  %v514_v46 = vld [vmem:[%s2300_s1 + $0x30] sm:$0xff] }
 0x1ea   :  { %457 = vadd.xlane.f32.xlu1 %v2004_v18  ;;  %471 = vadd.xlane.f32.xlu0 %v467_v19  ;;  %v435_v22 = vmul.f32 %v1734_v20, %v423_v17  ;;  %v468_v24 = vmul.f32 %v2004_v18, %v2004_v18 }
 0x1eb   :  { %v1736_v23 = vpop.eup %1735  ;;  %1629 = vmatprep.subr.bf16.mxu1 %v1628_v49 }
 0x1ec   :  { %v444_v25 = vmul.f32 %v1101_v8, %v435_v22  ;;  %v436_v26 = vmul.f32 %v1736_v23, %v424_v21 }
 0x1ed   :  { %1631 = vmatpush3.bf16.msra.mxu1 %v1628_v49 }
 0x1ee   :  { %473 = vadd.xlane.f32.xlu1 %v468_v24  ;;  %v2012_v27 = vadd.f32 %v1102_v10, %v444_v25  ;;  %v445_v28 = vmul.f32 %v1101_v8, %v436_v26  ;;  %1633 = vmatprep.subr.bf16.mxu1 %v1632_v52  ;;  %v511_v24 = vld [vmem:[%s2300_s1] sm:$0xff] }
 0x1ef   :  { %v519_v32 = vadd.f32 1.0, %v511_v24 }
 0x1f0   :  { %459 = vadd.xlane.f32.xlu0 %v2012_v27  ;;  %v2015_v29 = vadd.f32 %v1102_v10, %v445_v28  ;;  %v469_v30 = vmul.f32 %v2012_v27, %v2012_v27 }
 0x1f1   :  { %1635 = vmatpush3.bf16.msra.mxu1 %v1632_v52  ;;  %v522_v52 = vadd.f32 1.0, %v514_v46  ;;  %v1151_v46 = vld [vmem:[%s2295_s2 + $0x2f8] sm:$0xff] }
 0x1f2   :  { %461 = vadd.xlane.f32.xlu1 %v2015_v29  ;;  %v470_v31 = vmul.f32 %v2015_v29, %v2015_v29  ;;  %1637 = vmatprep.subr.bf16.mxu1 %v1636_v55 }
 0x1f4   :  { %475 = vadd.xlane.f32.xlu0 %v469_v30 }
 0x1f5   :  { %1639 = vmatpush3.bf16.msra.mxu1 %v1636_v55 }
 0x1f6   :  { %477 = vadd.xlane.f32.xlu1 %v470_v31  ;;  %1641 = vmatprep.subr.bf16.mxu1 %v2076_v58 }
 0x273   :  { %v456_v59 = vpop.xlane.xlu0 %455 }
 0x274   :  { %v463_v60 = vmul.f32 0.0078125, %v456_v59  ;;  %v1122_v59 = vld [vmem:[%s2295_s2 + $0x210] sm:$0xff] }
 0x276   :  { %v483_v63 = vmul.f32 %v463_v60, %v463_v60  ;;  %v495_v31 = vsub.f32 %v2000_v14, %v463_v60 }
 0x277   :  { %v458_v61 = vpop.xlane.xlu1 %457  ;;  %v472_v62 = vpop.xlane.xlu0 %471 }
 0x278   :  { %v464_v0 = vmul.f32 0.0078125, %v458_v61  ;;  %v479_v1 = vmul.f32 0.0078125, %v472_v62 }
 0x27a   :  { %v487_v2 = vsub.f32 %v479_v1, %v483_v63  ;;  %v484_v4 = vmul.f32 %v464_v0, %v464_v0  ;;  %v496_v38 = vsub.f32 %v2004_v18, %v464_v0  ;;  %v1124_v1 = vld [vmem:[%s2295_s2 + $0x220] sm:$0xff] }
 0x27b   :  { %v474_v3 = vpop.xlane.xlu1 %473 }
 0x27c   :  { %v491_v5 = vmax.f32 %v487_v2, 0.0  ;;  %v480_v6 = vmul.f32 0.0078125, %v474_v3  ;;  %v1125_v2 = vld [vmem:[%s2295_s2 + $0x228] sm:$0xff] }
 0x27d   :  { %v460_v7 = vpop.xlane.xlu0 %459  ;;  %v1648_v3 = vpack.c.bf16 %v1125_v2, %v1124_v1 }
 0x27e   :  { %v499_v8 = vadd.f32 1e-05, %v491_v5  ;;  %v488_v9 = vsub.f32 %v480_v6, %v484_v4  ;;  %v465_v10 = vmul.f32 0.0078125, %v460_v7  ;;  %v1126_v4 = vld [vmem:[%s2295_s2 + $0x230] sm:$0xff]  ;;  %v1127_v5 = vld [vmem:[%s2295_s2 + $0x238] sm:$0xff] }
 0x27f   :  { %v462_v11 = vpop.xlane.xlu1 %461  ;;  %v1652_v7 = vpack.c.bf16 %v1127_v5, %v1126_v4 }
 0x280   :  { %1737 = vrsqrt.f32 %v499_v8  ;;  %v492_v12 = vmax.f32 %v488_v9, 0.0  ;;  %v466_v13 = vmul.f32 0.0078125, %v462_v11  ;;  %v485_v17 = vmul.f32 %v465_v10, %v465_v10  ;;  %v1129_v9 = vld [vmem:[%s2295_s2 + $0x248] sm:$0xff]  ;;  %v1130_v11 = vld [vmem:[%s2295_s2 + $0x250] sm:$0xff] }
 0x281   :  { %v476_v15 = vpop.xlane.xlu0 %475  ;;  %v497_v47 = vsub.f32 %v2012_v27, %v465_v10 }
 0x282   :  { %v500_v16 = vadd.f32 1e-05, %v492_v12  ;;  %v481_v19 = vmul.f32 0.0078125, %v476_v15  ;;  %v486_v21 = vmul.f32 %v466_v13, %v466_v13  ;;  %v498_v50 = vsub.f32 %v2015_v29, %v466_v13  ;;  %v1123_v29 = vld [vmem:[%s2295_s2 + $0x218] sm:$0xff]  ;;  %v1132_v15 = vld [vmem:[%s2295_s2 + $0x260] sm:$0xff] }
 0x283   :  { %v478_v20 = vpop.xlane.xlu1 %477  ;;  %v1644_v63 = vpack.c.bf16 %v1123_v29, %v1122_v59  ;;  %v1131_v12 = vld [vmem:[%s2295_s2 + $0x258] sm:$0xff] }
 0x284   :  { %1739 = vrsqrt.f32 %v500_v16  ;;  %v489_v22 = vsub.f32 %v481_v19, %v485_v17  ;;  %v482_v23 = vmul.f32 0.0078125, %v478_v20  ;;  %v1660_v13 = vpack.c.bf16 %v1131_v12, %v1130_v11  ;;  %v1133_v16 = vld [vmem:[%s2295_s2 + $0x268] sm:$0xff]  ;;  %v1134_v19 = vld [vmem:[%s2295_s2 + $0x270] sm:$0xff]  ;;  %v1135_v20 = vld [vmem:[%s2295_s2 + $0x278] sm:$0xff] }
 0x285   :  { %v1664_v17 = vpack.c.bf16 %v1133_v16, %v1132_v15 }
 0x286   :  { %v493_v25 = vmax.f32 %v489_v22, 0.0  ;;  %v490_v26 = vsub.f32 %v482_v23, %v486_v21  ;;  %v1668_v21 = vpack.c.bf16 %v1135_v20, %v1134_v19  ;;  %v1136_v22 = vld [vmem:[%s2295_s2 + $0x280] sm:$0xff]  ;;  %v1137_v23 = vld [vmem:[%s2295_s2 + $0x288] sm:$0xff] }
 0x287   :  { %v1672_v24 = vpack.c.bf16 %v1137_v23, %v1136_v22 }
 0x288   :  { %v501_v28 = vadd.f32 1e-05, %v493_v25  ;;  %v494_v30 = vmax.f32 %v490_v26, 0.0  ;;  %v1138_v25 = vld [vmem:[%s2295_s2 + $0x290] sm:$0xff]  ;;  %v1139_v26 = vld [vmem:[%s2295_s2 + $0x298] sm:$0xff] }
 0x28a   :  { %v1738_v33 = vpop.eup %1737  ;;  %1741 = vrsqrt.f32 %v501_v28  ;;  %v502_v35 = vadd.f32 1e-05, %v494_v30  ;;  %v1676_v28 = vpack.c.bf16 %v1139_v26, %v1138_v25  ;;  %v1140_v30 = vld [vmem:[%s2295_s2 + $0x2a0] sm:$0xff] }
 0x28b   :  { %v507_v36 = vmul.f32 %v1738_v33, %v495_v31  ;;  %v1141_v31 = vld [vmem:[%s2295_s2 + $0x2a8] sm:$0xff]  ;;  %v1142_v33 = vld [vmem:[%s2295_s2 + $0x2b0] sm:$0xff] }
 0x28c   :  { %1743 = vrsqrt.f32 %v502_v35 }
 0x28d   :  { %v523_v39 = vmul.f32 %v519_v32, %v507_v36  ;;  %v1680_v32 = vpack.c.bf16 %v1141_v31, %v1140_v30  ;;  %v1684_v36 = vpack.c.bf16 %v1143_v34, %v1142_v33 }
 0x28e   :  { %v1740_v41 = vpop.eup %1739 }
 0x28f   :  { %v527_v14 = vadd.f32 %v523_v39, %v515_v37  ;;  %v508_v42 = vmul.f32 %v1740_v41, %v496_v38  ;;  %v1144_v37 = vld [vmem:[%s2295_s2 + $0x2c0] sm:$0xff]  ;;  %v1145_v38 = vld [vmem:[%s2295_s2 + $0x2c8] sm:$0xff]  ;;  %v1147_v41 = vld [vmem:[%s2295_s2 + $0x2d8] sm:$0xff] }
 0x290   :  { %v1688_v39 = vpack.c.bf16 %v1145_v38, %v1144_v37 }
 0x291   :  { %531 = vst [vmem:[#allocation2 + $0x1] sm:$0xff] %v527_v14  ;;  %v524_v45 = vmul.f32 %v520_v40, %v508_v42  ;;  %v1146_v40 = vld [vmem:[%s2295_s2 + $0x2d0] sm:$0xff]  ;;  %v1148_v42 = vld [vmem:[%s2295_s2 + $0x2e0] sm:$0xff] }
 0x293   :  { %v2099_v18 = vadd.f32 %v524_v45, %v516_v43  ;;  %v1149_v43 = vld [vmem:[%s2295_s2 + $0x2e8] sm:$0xff]  ;;  %v1150_v45 = vld [vmem:[%s2295_s2 + $0x2f0] sm:$0xff] }
 0x294   :  { %v1742_v49 = vpop.eup %1741  ;;  %v1696_v44 = vpack.c.bf16 %v1149_v43, %v1148_v42  ;;  %v1153_v42 = vld [vmem:[%s2299_s5 + $0x1] ss:$0 sm:$0xff] }
 0x295   :  { %532 = vst [vmem:[#allocation2 + $0x9] sm:$0xff] %v2099_v18  ;;  %v509_v51 = vmul.f32 %v1742_v49, %v497_v47 }
 0x296   :  { %v1744_v53 = vpop.eup %1743 }
 0x297   :  { %v525_v55 = vmul.f32 %v521_v48, %v509_v51  ;;  %v510_v57 = vmul.f32 %v1744_v53, %v498_v50  ;;  %v1119_v50 = vld [vmem:[%s2297_s3 + $0x1] ss:$0 sm:$0xff] }
 0x298   :  { %v536_v27 = vld [vmem:[#allocation2] sm:$0xff] }
 0x299   :  { %v529_v60 = vadd.f32 %v525_v55, %v517_v54  ;;  %v526_v61 = vmul.f32 %v522_v52, %v510_v57  ;;  %1430 = vmatprep.mubr.f32.mxu1 %v536_v27 }
 0x29b   :  { %533 = vst [vmem:[#allocation2 + $0x19] sm:$0xff] %v529_v60  ;;  %v530_v62 = vadd.f32 %v526_v61, %v518_v56 }
 0x29c   :  { %v537_v0 = vld [vmem:[#allocation2 + $0x8] sm:$0xff] }
 0x29d   :  { %534 = vst [vmem:[#allocation2 + $0x21] sm:$0xff] %v530_v62  ;;  %1431 = vmatmul.mubr.f32.vlgmr.msra.gmra.mrb[0].mxu1 %v537_v0  ;;  %v760_v35 = vld [vmem:[#allocation2 + $0x2] sm:$0xff]  ;;  %v761_v47 = vld [vmem:[#allocation2 + $0xa] sm:$0xff] }
 0x29e   :  { %1643 = vmatpush3.bf16.msra.mxu1 %v2076_v58  ;;  %v1128_v58 = vld [vmem:[%s2295_s2 + $0x240] sm:$0xff] }
 0x29f   :  { %1645 = vmatprep.subr.bf16.mxu1 %v1644_v63  ;;  %v1656_v10 = vpack.c.bf16 %v1129_v9, %v1128_v58 }
 0x2a2   :  { %1647 = vmatpush3.bf16.msra.mxu1 %v1644_v63  ;;  %v538_v6 = vld [vmem:[#allocation2 + $0x18] sm:$0xff] }
 0x2a3   :  { %1433 = vmatprep.mubr.f32.mxu1 %v538_v6  ;;  %1649 = vmatprep.subr.bf16.mxu1 %v1648_v3 }
 0x2a4   :  { %v539_v8 = vld [vmem:[#allocation2 + $0x20] sm:$0xff] }
 0x2a5   :  { %1434 = vmatmul.mubr.f32.gmra.mrb[2].mxu1 %v539_v8  ;;  %v762_v48 = vld [vmem:[#allocation2 + $0x1a] sm:$0xff]  ;;  %v763_v49 = vld [vmem:[#allocation2 + $0x22] sm:$0xff] }
 0x2a6   :  { %1651 = vmatpush3.bf16.msra.mxu1 %v1648_v3  ;;  %1468 = vmatprep.mubr.f32.mxu1 %v527_v14  ;;  %v1692_v14 = vpack.c.bf16 %v1147_v41, %v1146_v40  ;;  %v1152_v40 = vld [vmem:[%s2298_s4 + $0x1] ss:$0 sm:$0xff] }
 0x2a7   :  { %1653 = vmatprep.subr.bf16.mxu1 %v1652_v7 }
 0x2aa   :  { %1655 = vmatpush3.bf16.msra.mxu1 %v1652_v7 }
 0x2ab   :  { %1657 = vmatprep.subr.bf16.mxu1 %v1656_v10 }
 0x2ae   :  { %1659 = vmatpush3.bf16.msra.mxu1 %v1656_v10 }
 0x2af   :  { %1661 = vmatprep.subr.bf16.mxu1 %v1660_v13 }
 0x2b2   :  { %1663 = vmatpush3.bf16.msra.mxu1 %v1660_v13 }
 0x2b3   :  { %1665 = vmatprep.subr.bf16.mxu1 %v1664_v17 }
 0x2b6   :  { %1667 = vmatpush3.bf16.msra.mxu1 %v1664_v17 }
 0x2b7   :  { %1669 = vmatprep.subr.bf16.mxu1 %v1668_v21 }
 0x2ba   :  { %1671 = vmatpush3.bf16.msra.mxu1 %v1668_v21 }
 0x2bb   :  { %1673 = vmatprep.subr.bf16.mxu1 %v1672_v24 }
 0x2bd   :  { %1469 = vmatmul.mubr.f32.vlgmr.msra.gmra.mrb[0].mxu1 %v2099_v18  ;;  %v1700_v18 = vpack.c.bf16 %v1151_v46, %v1150_v45 }
 0x2be   :  { %1471 = vmatprep.mubr.f32.mxu1 %v529_v60  ;;  %1675 = vmatpush3.bf16.msra.mxu1 %v1672_v24 }
 0x2bf   :  { %1677 = vmatprep.subr.bf16.mxu1 %v1676_v28 }
 0x2c1   :  { %1472 = vmatmul.mubr.f32.gmra.mrb[2].mxu1 %v530_v62 }
 0x2c2   :  { %1679 = vmatpush3.bf16.msra.mxu1 %v1676_v28  ;;  %1506 = vmatprep.mubr.f32.mxu1 %v760_v35 }
 0x2c3   :  { %1681 = vmatprep.subr.bf16.mxu1 %v1680_v32 }
 0x2c6   :  { %1683 = vmatpush3.bf16.msra.mxu1 %v1680_v32 }
 0x2c7   :  { %1685 = vmatprep.subr.bf16.mxu1 %v1684_v36 }
 0x2ca   :  { %1687 = vmatpush3.bf16.msra.mxu1 %v1684_v36 }
 0x2cb   :  { %1689 = vmatprep.subr.bf16.mxu1 %v1688_v39 }
 0x2ce   :  { %1691 = vmatpush3.bf16.msra.mxu1 %v1688_v39 }
 0x2cf   :  { %1693 = vmatprep.subr.bf16.mxu1 %v1692_v14 }
 0x2d2   :  { %1695 = vmatpush3.bf16.msra.mxu1 %v1692_v14 }
 0x2d3   :  { %1697 = vmatprep.subr.bf16.mxu1 %v1696_v44 }
 0x2d6   :  { %1699 = vmatpush3.bf16.msra.mxu1 %v1696_v44 }
 0x2d7   :  { %1701 = vmatprep.subr.bf16.mxu1 %v1700_v18 }
 0x2da   :  { %1703 = vmatpush3.bf16.msra.mxu1 %v1700_v18 }
 0x2dd   :  { %1507 = vmatmul.mubr.f32.vlgmr.msra.gmra.mrb[0].mxu1 %v761_v47 }
 0x2de   :  { %1509 = vmatprep.mubr.f32.mxu1 %v762_v48 }
 0x2e1   :  { %1510 = vmatmul.mubr.f32.gmra.mrb[2].mxu1 %v763_v49 }
 0x3b0   :  { %v1508_v51 = vpop.f32.mrb[0].mxu1 }
 0x3b1   :  { %v1708_v52 = vadd.f32 %v1508_v51, %v1119_v50  ;;  %v847_v53 = vpop.f32.mrb[1].mxu1 }
 0x3b2   :  { %v1709_v54 = vadd.f32 %v1119_v50, %v847_v53 }
 0x3b3   :  { %v871_v55 = vmax.f32 %v1708_v52, 0.0 }
 0x3b4   :  { %v2205_v56 = vmax.f32 %v1709_v54, 0.0  ;;  %v1511_v57 = vpop.f32.mrb[2].mxu1 }
 0x3b5   :  { %876 = vadd.xlane.f32.xlu1 %v871_v55  ;;  %v857_v27 = vpop.f32.mrb[3].mxu1  ;;  %v1710_v59 = vadd.f32 %v1511_v57, %v1119_v50  ;;  %v887_v29 = vmul.f32 %v871_v55, %v871_v55 }
 0x3b6   :  { %874 = vadd.xlane.f32.xlu0 %v2205_v56  ;;  %v1711_v60 = vadd.f32 %v1119_v50, %v857_v27  ;;  %v886_v61 = vmul.f32 %v2205_v56, %v2205_v56 }
 0x3b7   :  { %v2210_v62 = vmax.f32 %v1710_v59, 0.0 }
 0x3b8   :  { %v2212_v63 = vmax.f32 %v1711_v60, 0.0  ;;  %v13_v60 = vstv %s2301_s7 }
 0x3b9   :  { %892 = vadd.xlane.f32.xlu1 %v887_v29  ;;  %v889_v0 = vmul.f32 %v2210_v62, %v2210_v62  ;;  %14 = vst [vmem:[#allocation3] sm:$0x1] %v13_v60 }
 0x3ba   :  { %890 = vadd.xlane.f32.xlu0 %v886_v61  ;;  %v888_v1 = vmul.f32 %v2212_v63, %v2212_v63 }
 0x3bd   :  { %880 = vadd.xlane.f32.xlu1 %v2210_v62 }
 0x3be   :  { %878 = vadd.xlane.f32.xlu0 %v2212_v63 }
 0x3c1   :  { %896 = vadd.xlane.f32.xlu1 %v889_v0 }
 0x3c2   :  { %894 = vadd.xlane.f32.xlu0 %v888_v1 }
 0x442   :  { %v877_v2 = vpop.xlane.xlu1 %876 }
 0x443   :  { %v883_v3 = vmul.f32 0.0078125, %v877_v2  ;;  %v875_v4 = vpop.xlane.xlu0 %874 }
 0x444   :  { %v882_v5 = vmul.f32 0.0078125, %v875_v4 }
 0x445   :  { %v903_v7 = vmul.f32 %v883_v3, %v883_v3  ;;  %v915_v37 = vsub.f32 %v871_v55, %v883_v3 }
 0x446   :  { %v893_v6 = vpop.xlane.xlu1 %892  ;;  %v902_v9 = vmul.f32 %v882_v5, %v882_v5  ;;  %v914_v39 = vsub.f32 %v2205_v56, %v882_v5 }
 0x447   :  { %v899_v8 = vmul.f32 0.0078125, %v893_v6  ;;  %v891_v58 = vpop.xlane.xlu0 %890 }
 0x448   :  { %v898_v10 = vmul.f32 0.0078125, %v891_v58 }
 0x449   :  { %v907_v11 = vsub.f32 %v899_v8, %v903_v7 }
 0x44a   :  { %v906_v12 = vsub.f32 %v898_v10, %v902_v9  ;;  %v881_v13 = vpop.xlane.xlu1 %880 }
 0x44b   :  { %v911_v15 = vmax.f32 %v907_v11, 0.0  ;;  %v885_v16 = vmul.f32 0.0078125, %v881_v13  ;;  %v879_v17 = vpop.xlane.xlu0 %878 }
 0x44c   :  { %v910_v19 = vmax.f32 %v906_v12, 0.0  ;;  %v884_v20 = vmul.f32 0.0078125, %v879_v17 }
 0x44d   :  { %v919_v21 = vadd.f32 1e-05, %v911_v15  ;;  %v905_v24 = vmul.f32 %v885_v16, %v885_v16  ;;  %v917_v47 = vsub.f32 %v2210_v62, %v885_v16 }
 0x44e   :  { %v918_v22 = vadd.f32 1e-05, %v910_v19  ;;  %v897_v23 = vpop.xlane.xlu1 %896  ;;  %v904_v28 = vmul.f32 %v884_v20, %v884_v20  ;;  %v916_v49 = vsub.f32 %v2212_v63, %v884_v20 }
 0x44f   :  { %1745 = vrsqrt.f32 %v919_v21  ;;  %v901_v25 = vmul.f32 0.0078125, %v897_v23  ;;  %v895_v26 = vpop.xlane.xlu0 %894 }
 0x450   :  { %1747 = vrsqrt.f32 %v918_v22  ;;  %v900_v30 = vmul.f32 0.0078125, %v895_v26 }
 0x451   :  { %v909_v31 = vsub.f32 %v901_v25, %v905_v24 }
 0x452   :  { %v908_v32 = vsub.f32 %v900_v30, %v904_v28 }
 0x453   :  { %v913_v33 = vmax.f32 %v909_v31, 0.0  ;;  %v1155_v31 = vld [vmem:[%s2300_s1 + $0x50] sm:$0xff] }
 0x454   :  { %v912_v34 = vmax.f32 %v908_v32, 0.0 }
 0x455   :  { %v921_v35 = vadd.f32 1e-05, %v913_v33  ;;  %v1154_v33 = vld [vmem:[%s2300_s1 + $0x40] sm:$0xff] }
 0x456   :  { %v920_v36 = vadd.f32 1e-05, %v912_v34 }
 0x457   :  { %1749 = vrsqrt.f32 %v921_v35  ;;  %v1014_v35 = vadd.f32 1.0, %v1155_v31 }
 0x458   :  { %1751 = vrsqrt.f32 %v920_v36 }
 0x459   :  { %v1746_v38 = vpop.eup %1745 }
 0x45a   :  { %v1748_v41 = vpop.eup %1747  ;;  %v927_v14 = vmul.f32 %v1746_v38, %v915_v37  ;;  %v1013_v38 = vadd.f32 1.0, %v1154_v33 }
 0x45b   :  { %v926_v43 = vmul.f32 %v1748_v41, %v914_v39  ;;  %v1159_v41 = vld [vmem:[%s2300_s1 + $0x58] sm:$0xff] }
 0x45c   :  { %v936_v44 = vmul.f32 %v1152_v40, %v927_v14 }
 0x45d   :  { %v935_v45 = vmul.f32 %v1152_v40, %v926_v43  ;;  %v1158_v43 = vld [vmem:[%s2300_s1 + $0x48] sm:$0xff] }
 0x45e   :  { %v2227_v46 = vadd.f32 %v1153_v42, %v936_v44  ;;  %v1162_v44 = vld [vmem:[%s2302_s6] ss:$0 sm:$0xff] }
 0x45f   :  { %v2229_v18 = vadd.f32 %v1153_v42, %v935_v45 }
 0x460   :  { %950 = vadd.xlane.f32.xlu1 %v2227_v46  ;;  %v961_v51 = vmul.f32 %v2227_v46, %v2227_v46 }
 0x461   :  { %v1750_v48 = vpop.eup %1749  ;;  %948 = vadd.xlane.f32.xlu0 %v2229_v18  ;;  %v960_v53 = vmul.f32 %v2229_v18, %v2229_v18 }
 0x462   :  { %v1752_v50 = vpop.eup %1751  ;;  %v929_v52 = vmul.f32 %v1750_v48, %v917_v47  ;;  %v1156_v47 = vld [vmem:[%s2300_s1 + $0x60] sm:$0xff] }
 0x463   :  { %v928_v54 = vmul.f32 %v1752_v50, %v916_v49 }
 0x464   :  { %966 = vadd.xlane.f32.xlu1 %v961_v51  ;;  %v938_v55 = vmul.f32 %v1152_v40, %v929_v52 }
 0x465   :  { %964 = vadd.xlane.f32.xlu0 %v960_v53  ;;  %v937_v56 = vmul.f32 %v1152_v40, %v928_v54 }
 0x466   :  { %v2239_v57 = vadd.f32 %v1153_v42, %v938_v55  ;;  %v1015_v55 = vadd.f32 1.0, %v1156_v47 }
 0x467   :  { %v2241_v27 = vadd.f32 %v1153_v42, %v937_v56 }
 0x468   :  { %954 = vadd.xlane.f32.xlu1 %v2239_v57  ;;  %v963_v59 = vmul.f32 %v2239_v57, %v2239_v57 }
 0x469   :  { %952 = vadd.xlane.f32.xlu0 %v2241_v27  ;;  %v962_v29 = vmul.f32 %v2241_v27, %v2241_v27 }
 0x46c   :  { %970 = vadd.xlane.f32.xlu1 %v963_v59 }
 0x46d   :  { %968 = vadd.xlane.f32.xlu0 %v962_v29  ;;  %v1161_v29 = vld [vmem:[%s2300_s1 + $0x78] sm:$0xff] }
 0x4ed   :  { %v951_v61 = vpop.xlane.xlu1 %950 }
 0x4ee   :  { %v957_v62 = vmul.f32 0.0078125, %v951_v61  ;;  %v949_v63 = vpop.xlane.xlu0 %948 }
 0x4ef   :  { %v956_v0 = vmul.f32 0.0078125, %v949_v63 }
 0x4f0   :  { %v977_v2 = vmul.f32 %v957_v62, %v957_v62  ;;  %v989_v34 = vsub.f32 %v2227_v46, %v957_v62  ;;  %v1157_v46 = vld [vmem:[%s2300_s1 + $0x70] sm:$0xff] }
 0x4f1   :  { %v967_v1 = vpop.xlane.xlu1 %966  ;;  %v976_v5 = vmul.f32 %v956_v0, %v956_v0  ;;  %v988_v37 = vsub.f32 %v2229_v18, %v956_v0  ;;  %v1016_v51 = vadd.f32 1.0, %v1157_v46 }
 0x4f2   :  { %v973_v3 = vmul.f32 0.0078125, %v967_v1  ;;  %v965_v4 = vpop.xlane.xlu0 %964 }
 0x4f3   :  { %v972_v6 = vmul.f32 0.0078125, %v965_v4 }
 0x4f4   :  { %v981_v7 = vsub.f32 %v973_v3, %v977_v2  ;;  %v1163_v2 = vld [vmem:[#allocation3] ss:$0 sm:$0xff] }
 0x4f5   :  { %v980_v8 = vsub.f32 %v972_v6, %v976_v5  ;;  %v955_v58 = vpop.xlane.xlu1 %954 }
 0x4f6   :  { %v985_v9 = vmax.f32 %v981_v7, 0.0  ;;  %v959_v10 = vmul.f32 0.0078125, %v955_v58  ;;  %v953_v11 = vpop.xlane.xlu0 %952 }
 0x4f7   :  { %v984_v12 = vmax.f32 %v980_v8, 0.0  ;;  %v958_v13 = vmul.f32 0.0078125, %v953_v11 }
 0x4f8   :  { %v993_v15 = vadd.f32 1e-05, %v985_v9  ;;  %v979_v19 = vmul.f32 %v959_v10, %v959_v10  ;;  %v991_v49 = vsub.f32 %v2239_v57, %v959_v10  ;;  %v1160_v57 = vld [vmem:[%s2300_s1 + $0x68] sm:$0xff] }
 0x4f9   :  { %v992_v16 = vadd.f32 1e-05, %v984_v12  ;;  %v971_v17 = vpop.xlane.xlu1 %970  ;;  %v978_v22 = vmul.f32 %v958_v13, %v958_v13  ;;  %v990_v53 = vsub.f32 %v2241_v27, %v958_v13 }
 0x4fa   :  { %1753 = vrsqrt.f32 %v993_v15  ;;  %v975_v20 = vmul.f32 0.0078125, %v971_v17  ;;  %v969_v21 = vpop.xlane.xlu0 %968 }
 0x4fb   :  { %1755 = vrsqrt.f32 %v992_v16  ;;  %v974_v23 = vmul.f32 0.0078125, %v969_v21 }
 0x4fc   :  { %v983_v24 = vsub.f32 %v975_v20, %v979_v19 }
 0x4fd   :  { %v982_v25 = vsub.f32 %v974_v23, %v978_v22 }
 0x4fe   :  { %v987_v26 = vmax.f32 %v983_v24, 0.0 }
 0x4ff   :  { %v986_v28 = vmax.f32 %v982_v25, 0.0 }
 0x500   :  { %v995_v30 = vadd.f32 1e-05, %v987_v26 }
 0x501   :  { %v994_v32 = vadd.f32 1e-05, %v986_v28 }
 0x502   :  { %1757 = vrsqrt.f32 %v995_v30 }
 0x503   :  { %1759 = vrsqrt.f32 %v994_v32 }
 0x504   :  { %v1754_v36 = vpop.eup %1753 }
 0x505   :  { %v1756_v39 = vpop.eup %1755  ;;  %v1001_v40 = vmul.f32 %v1754_v36, %v989_v34 }
 0x506   :  { %v1000_v14 = vmul.f32 %v1756_v39, %v988_v37 }
 0x507   :  { %v1018_v42 = vmul.f32 %v1014_v35, %v1001_v40 }
 0x508   :  { %v1017_v45 = vmul.f32 %v1013_v38, %v1000_v14 }
 0x509   :  { %v1022_v18 = vadd.f32 %v1159_v41, %v1018_v42 }
 0x50a   :  { %v1021_v48 = vadd.f32 %v1158_v43, %v1017_v45 }
 0x50b   :  { %v1033_v50 = vmul.f32 %v1162_v44, %v1022_v18 }
 0x50c   :  { %v1758_v52 = vpop.eup %1757  ;;  %v1032_v54 = vmul.f32 %v1162_v44, %v1021_v48 }
 0x50d   :  { %v1760_v56 = vpop.eup %1759  ;;  %1038 = vadd.xlane.f32.xlu1 %v1033_v50  ;;  %v1003_v59 = vmul.f32 %v1758_v52, %v991_v49 }
 0x50e   :  { %1036 = vadd.xlane.f32.xlu0 %v1032_v54  ;;  %v1002_v60 = vmul.f32 %v1760_v56, %v990_v53 }
 0x50f   :  { %v1020_v61 = vmul.f32 %v1016_v51, %v1003_v59 }
 0x510   :  { %v1019_v62 = vmul.f32 %v1015_v55, %v1002_v60 }
 0x511   :  { %v1024_v63 = vadd.f32 %v1161_v29, %v1020_v61 }
 0x512   :  { %v1023_v0 = vadd.f32 %v1160_v57, %v1019_v62 }
 0x513   :  { %v1035_v27 = vmul.f32 %v1162_v44, %v1024_v63 }
 0x514   :  { %v1034_v1 = vmul.f32 %v1162_v44, %v1023_v0 }
 0x515   :  { %1042 = vadd.xlane.f32.xlu1 %v1035_v27 }
 0x516   :  { %1040 = vadd.xlane.f32.xlu0 %v1034_v1 }
 0x59a   :  { %v1039_v3 = vpop.xlane.xlu1 %1038 }
 0x59b   :  { %v1052_v4 = vadd.f32 %v1163_v2, %v1039_v3  ;;  %v1037_v5 = vpop.xlane.xlu0 %1036 }
 0x59c   :  { %v1051_v6 = vadd.f32 %v1163_v2, %v1037_v5 }
 0x59d   :  { %v1056_v7 = vmax.f32 %v1052_v4, 0.0 }
 0x59e   :  { %v1055_v8 = vmax.f32 %v1051_v6, 0.0 }
 0x59f   :  { %1061 = vst.msk [vmem:[%s2303_s8 + $0x8] sm:$0xff] %vm1059_vm0, %v1056_v7 }
 0x5a0   :  { %1060 = vst.msk [vmem:[%s2303_s8] sm:$0xff] %vm1059_vm0, %v1055_v8 }
 0x5a2   :  { %v1043_v58 = vpop.xlane.xlu1 %1042 }
 0x5a3   :  { %v1054_v9 = vadd.f32 %v1163_v2, %v1043_v58  ;;  %v1041_v10 = vpop.xlane.xlu0 %1040 }
 0x5a4   :  { %v1053_v11 = vadd.f32 %v1163_v2, %v1041_v10 }
 0x5a5   :  { %v1058_v12 = vmax.f32 %v1054_v9, 0.0 }
 0x5a6   :  { %v1057_v13 = vmax.f32 %v1053_v11, 0.0 }
 0x5a7   :  { %1063 = vst.msk [vmem:[%s2303_s8 + $0x18] sm:$0xff] %vm1059_vm0, %v1058_v12 }
 0x5a8   :  { %1062 = vst.msk [vmem:[%s2303_s8 + $0x10] sm:$0xff] %vm1059_vm0, %v1057_v13 }

</bundles_post_ra>
